<compile_context>
chip_gen: v7x
topology: tpu7x:2x2x1
jax: 0.10.0
libtpu: 0.0.40
codegen_flags: <defaults>
</compile_context>

<pallas_src>
import jax
import jax.numpy as jnp
from jax import lax
from jax.experimental import pallas as pl
from jax.experimental.pallas import tpu as pltpu

LANE = 128     # pad every feature/channel dim to this
SUBLANE = 8    # row counts must be multiples of this


def _round_up(x, m):
    return (x + m - 1) // m * m


# ---------------------------------------------------------------------------
# Kernel: one batch tile per grid step.
# ---------------------------------------------------------------------------
def model_kernel(x_ref, w1_ref, b1_ref, wb_ref, bb_ref, wr_ref, br_ref,
                 wo_ref, bo_ref, out_ref):
    rows, _ = x_ref.shape            # rows = batch_tile * T
    bt, _ = out_ref.shape            # batch tile
    T = rows // bt
    F = w1_ref.shape[1]              # padded num_features
    n_blocks = wb_ref.shape[0]

    # Temporal position of every row (row = b*T + t); used to emulate
    # ReplicationPad1d(1) at each sequence's edges without a padded copy.
    t_idx = lax.broadcasted_iota(jnp.int32, (rows, 1), 0) % T
    is_first = t_idx == 0
    is_last = t_idx == (T - 1)

    def conv3_bn_relu(h, w, b):
        # h: (rows, Fin_p) f32.  im2col over the 3 taps with replication at
        # the temporal edges, then ONE lane-dense MXU matmul.  BN scale is
        # already folded into w; b is the folded BN bias.
        h_prev = jnp.where(is_first, h,
                           jnp.concatenate([h[:1], h[:-1]], axis=0))
        h_next = jnp.where(is_last, h,
                           jnp.concatenate([h[1:], h[-1:]], axis=0))
        cols = jnp.concatenate([h_prev, h, h_next], axis=-1)   # (rows, 3*Fin)
        acc = jnp.dot(cols.astype(jnp.bfloat16), w,
                      preferred_element_type=jnp.float32) + b
        return jnp.maximum(acc, 0.0)

    # conv1 (Dropout(p=0.25) is identity in eval mode)
    h = conv3_bn_relu(x_ref[...], w1_ref[...], b1_ref[...])    # f32 (rows, F)

    # residual blocks: pad + conv3 + BN + ReLU (+ dropout=identity) + skip
    for i in range(n_blocks):
        h = h + conv3_bn_relu(h, wb_ref[i], bb_ref[i])

    # reduce: Conv1d(F, F, kernel_size=T) over the full window -> single
    # matmul with contraction depth T*F.
    h3 = h.reshape(bt, T, F)
    hr = jnp.concatenate([h3[:, t, :] for t in range(T)],
                         axis=-1).astype(jnp.bfloat16)          # (bt, T*F)
    y = jnp.dot(hr, wr_ref[...], preferred_element_type=jnp.float32)
    y = jnp.maximum(y + br_ref[...], 0.0)

    # out Linear + sigmoid (eval mode); lane-dense (bt, 128) store.
    z = jnp.dot(y.astype(jnp.bfloat16), wo_ref[...],
                preferred_element_type=jnp.float32) + bo_ref[...]
    out_ref[...] = jax.nn.sigmoid(z)


# ---------------------------------------------------------------------------
# Wrapper
# ---------------------------------------------------------------------------
def basic_temporal_model(x, params, out_channels, *, batch_tile=8):
    """x: (B, T, J, C) float32 -> (B, out_channels) float32."""
    B, T, J, C = x.shape
    cin = J * C
    cin_p = params["w1"].shape[0] // 3
    F_p = params["w1"].shape[1]
    out_p = params["wo"].shape[1]
    K = params["wr"].shape[0] // F_p
    assert K == T, "reduce kernel size (2*time_window+1) must equal T"
    assert batch_tile % SUBLANE == 0

    B_p = _round_up(B, batch_tile)
    rows_tile = batch_tile * T

    # channels-last, pad Cin -> lane multiple and batch -> tile multiple,
    # flatten (B, T) into rows so rows-per-tile is a multiple of 8.
    x2 = x.reshape(B, T, cin).astype(jnp.float32)
    x2 = jnp.pad(x2, ((0, B_p - B), (0, 0), (0, cin_p - cin)))
    x2 = x2.reshape(B_p * T, cin_p)

    def _full_spec(a):
        zeros = (0,) * a.ndim
        return pl.BlockSpec(a.shape, lambda i: zeros)

    operands = (x2, params["w1"], params["b1"], params["wb"], params["bb"],
                params["wr"], params["br"], params["wo"], params["bo"])
    in_specs = [pl.BlockSpec((rows_tile, cin_p), lambda i: (i, 0))]
    in_specs += [_full_spec(a) for a in operands[1:]]
    out_specs = pl.BlockSpec((batch_tile, out_p), lambda i: (i, 0))

    n_blocks = params["wb"].shape[0]
    flops = (2 * B_p * T * (3 * cin_p) * F_p
             + 2 * n_blocks * B_p * T * (3 * F_p) * F_p
             + 2 * B_p * (T * F_p) * F_p
             + 2 * B_p * F_p * out_p)
    bytes_accessed = (sum(int(a.size) * a.dtype.itemsize for a in operands)
                      + B_p * out_p * 4)

    out = pl.pallas_call(
        model_kernel,
        out_shape=jax.ShapeDtypeStruct((B_p, out_p), jnp.float32),
        grid=(B_p // batch_tile,),
        in_specs=in_specs,
        out_specs=out_specs,
        compiler_params=pltpu.CompilerParams(
            dimension_semantics=("parallel",),
            vmem_limit_bytes=32 * 1024 * 1024),
        cost_estimate=pl.CostEstimate(
            flops=flops, transcendentals=B_p * out_p,
            bytes_accessed=bytes_accessed),
    )(*operands)
    return out[:B, :out_channels]


# ---------------------------------------------------------------------------
# Host-side parameter handling
# ---------------------------------------------------------------------------
def init_raw_params(key, in_channels, num_features, out_channels, time_window,
                    num_blocks):
    """Deterministic PyTorch-layout eval-mode parameters."""
    F, K = num_features, 2 * time_window + 1
    keys = iter(jax.random.split(key, 64))

    def nrm(shape, std):
        return std * jax.random.normal(next(keys), shape, jnp.float32)

    def bn(f):
        return (1.0 + nrm((f,), 0.1), nrm((f,), 0.1),
                nrm((f,), 0.1), 1.0 + jnp.abs(nrm((f,), 0.1)))

    return dict(
        w1=nrm((F, in_channels, 3), 0.2), bn1=bn(F),
        wb=[nrm((F, F, 3), 0.1) for _ in range(num_blocks)],
        bnb=[bn(F) for _ in range(num_blocks)],
        wr=nrm((F, F, K), 0.08), br=nrm((F,), 0.1),
        wo=nrm((out_channels, F), 0.15), bo=nrm((out_channels,), 0.1),
    )


def _fold_bn(w, gamma, beta, mean, var, eps=1e-5):
    # Fold eval-mode BatchNorm1d into the conv weight (per output channel).
    scale = gamma / jnp.sqrt(var + eps)
    return w * scale[:, None, None], beta - mean * scale


def prepare_params(raw, in_channels, num_features, out_channels):
    """Fold BN, pad to lane width, im2col-concat taps, cast weights to bf16."""
    F = num_features
    cin_p = _round_up(in_channels, LANE)
    F_p = _round_up(F, LANE)
    out_p = _round_up(out_channels, LANE)

    def conv_to_im2col(w, cin, cin_pad):
        # torch Conv1d weight (Fout, Cin, K) -> (K*Cin_pad, F_p) bf16.
        K = w.shape[-1]
        wt = jnp.transpose(w, (2, 1, 0))                     # (K, Cin, Fout)
        wp = jnp.zeros((K, cin_pad, F_p), jnp.float32)
        wp = wp.at[:, :cin, :F].set(wt)
        return wp.reshape(K * cin_pad, F_p).astype(jnp.bfloat16)

    def pad_bias(b, width):
        return jnp.zeros((1, width), jnp.float32).at[0, :b.shape[0]].set(b)

    w1f, b1 = _fold_bn(raw["w1"], *raw["bn1"])
    wb_list, bb_list = [], []
    for w, bnp in zip(raw["wb"], raw["bnb"]):
        wf, bf = _fold_bn(w, *bnp)
        wb_list.append(conv_to_im2col(wf, F, F_p))
        bb_list.append(pad_bias(bf, F_p))

    wo = jnp.zeros((F_p, out_p), jnp.float32)
    wo = wo.at[:F, :out_channels].set(raw["wo"].T)

    return dict(
        w1=conv_to_im2col(w1f, in_channels, cin_p),   # (3*Cin_p, F_p) bf16
        b1=pad_bias(b1, F_p),                         # (1, F_p) f32
        wb=jnp.stack(wb_list),                        # (NB, 3*F_p, F_p) bf16
        bb=jnp.stack(bb_list),                        # (NB, 1, F_p) f32
        wr=conv_to_im2col(raw["wr"], F, F_p),         # (K*F_p, F_p) bf16
        br=pad_bias(raw["br"], F_p),
        wo=wo.astype(jnp.bfloat16),                   # (F_p, out_p) bf16
        bo=pad_bias(raw["bo"], out_p),
    )


def reference_forward(x, raw, eps=1e-5):
    """Pure-JAX f32 reference with PyTorch eval-mode semantics."""
    B, T, J, C = x.shape
    h = x.reshape(B, T, J * C).astype(jnp.float32)   # (B, T, Cin)

    def conv_bn_relu(h, w, bn):
        gamma, beta, mean, var = bn
        hp = jnp.concatenate([h[:, :1], h, h[:, -1:]], axis=1)   # rep pad 1
        y = sum(jnp.einsum("btc,fc->btf", hp[:, k:k + T], w[:, :, k])
                for k in range(3))
        scale = gamma / jnp.sqrt(var + eps)
        return jnp.maximum(y * scale + (beta - mean * scale), 0.0)

    h = conv_bn_relu(h, raw["w1"], raw["bn1"])
    for w, bn in zip(raw["wb"], raw["bnb"]):
        h = h + conv_bn_relu(h, w, bn)
    y = jnp.einsum("btc,fct->bf", h, raw["wr"]) + raw["br"]
    y = jnp.maximum(y, 0.0)
    z = y @ raw["wo"].T + raw["bo"]
    return jax.nn.sigmoid(z)


if __name__ == "__main__":
    key = jax.random.PRNGKey(0)
    kx, kp = jax.random.split(key)

    # Small shapes consistent with the module (T must equal 2*time_window+1
    # for x.view(B, -1) + Linear(num_features, out_channels) to be valid).
    B, J, C = 12, 2, 4
    time_window, num_blocks = 2, 2
    T = 2 * time_window + 1            # 5
    in_channels = J * C                # 8
    num_features = 32
    out_channels = 4

    x = jax.random.normal(kx, (B, T, J, C), jnp.float32)
    raw = init_raw_params(kp, in_channels, num_features, out_channels,
                          time_window, num_blocks)
    params = prepare_params(raw, in_channels, num_features, out_channels)

    out = jax.block_until_ready(
        basic_temporal_model(x, params, out_channels, batch_tile=8))
    ref = jax.block_until_ready(reference_forward(x, raw))

    assert out.shape == (B, out_channels), out.shape
    assert bool(jnp.all(jnp.isfinite(out)))
    max_err = float(jnp.max(jnp.abs(out - ref)))
    # bf16 matmul operands vs f32 reference -> small quantization error.
    assert max_err < 2e-2, f"max abs err vs f32 reference: {max_err}"
    print("KERNEL_OK")
</pallas_src>

<mosaic_0001>
module attributes {stable_mosaic.version = 11 : i64} {
  func.func @model_kernel(%arg0: i32, %arg1: memref<40x128xf32, #tpu.memory_space<vmem>>, %arg2: memref<384x128xbf16, #tpu.memory_space<vmem>>, %arg3: memref<1x128xf32, #tpu.memory_space<vmem>>, %arg4: memref<2x384x128xbf16, #tpu.memory_space<vmem>>, %arg5: memref<2x1x128xf32, #tpu.memory_space<vmem>>, %arg6: memref<640x128xbf16, #tpu.memory_space<vmem>>, %arg7: memref<1x128xf32, #tpu.memory_space<vmem>>, %arg8: memref<128x128xbf16, #tpu.memory_space<vmem>>, %arg9: memref<1x128xf32, #tpu.memory_space<vmem>>, %arg10: memref<8x128xf32, #tpu.memory_space<vmem>>) attributes {dimension_semantics = [#tpu.dimension_semantics<parallel>], iteration_bounds = array<i64: 2>, scalar_prefetch = 0 : i64, scratch_operands = 0 : i64, tpu.core_type = #tpu.core_type<tc>, window_params = [{transform_indices = @transform_0, window_bounds = array<i64: 40, 128>}, {pipeline_mode = #tpu.pipeline_mode<synchronous>, transform_indices = @transform_1, window_bounds = array<i64: 384, 128>}, {pipeline_mode = #tpu.pipeline_mode<synchronous>, transform_indices = @transform_2, window_bounds = array<i64: 1, 128>}, {pipeline_mode = #tpu.pipeline_mode<synchronous>, transform_indices = @transform_3, window_bounds = array<i64: 2, 384, 128>}, {pipeline_mode = #tpu.pipeline_mode<synchronous>, transform_indices = @transform_4, window_bounds = array<i64: 2, 1, 128>}, {pipeline_mode = #tpu.pipeline_mode<synchronous>, transform_indices = @transform_5, window_bounds = array<i64: 640, 128>}, {pipeline_mode = #tpu.pipeline_mode<synchronous>, transform_indices = @transform_6, window_bounds = array<i64: 1, 128>}, {pipeline_mode = #tpu.pipeline_mode<synchronous>, transform_indices = @transform_7, window_bounds = array<i64: 128, 128>}, {pipeline_mode = #tpu.pipeline_mode<synchronous>, transform_indices = @transform_8, window_bounds = array<i64: 1, 128>}, {transform_indices = @transform_9, window_bounds = array<i64: 8, 128>}]} {
    %0 = tpu.iota {dimensions = array<i32: 0>} : vector<40x1xi32>
    %c5_i32 = arith.constant 5 : i32
    %c0_i32 = arith.constant 0 : i32
    %1 = arith.cmpi eq, %c5_i32, %c0_i32 : i32
    %c1_i32 = arith.constant 1 : i32
    %2 = arith.select %1, %c1_i32, %c5_i32 : i32
    %3 = vector.broadcast %2 : i32 to vector<40x1xi32>
    %4 = arith.remsi %0, %3 : vector<40x1xi32>
    %c0_i32_0 = arith.constant 0 : i32
    %5 = vector.broadcast %c0_i32_0 : i32 to vector<40x1xi32>
    %6 = arith.cmpi ne, %4, %5 : vector<40x1xi32>
    %c0_i32_1 = arith.constant 0 : i32
    %7 = vector.broadcast %c0_i32_1 : i32 to vector<40x1xi32>
    %8 = arith.cmpi slt, %4, %7 : vector<40x1xi32>
    %c0_i32_2 = arith.constant 0 : i32
    %9 = arith.cmpi slt, %2, %c0_i32_2 : i32
    %10 = vector.broadcast %9 : i1 to vector<40x1xi1>
    %11 = vector.broadcast %10 : vector<40x1xi1> to vector<40x1xi1>
    %12 = arith.xori %8, %11 : vector<40x1xi1>
    %13 = arith.andi %12, %6 : vector<40x1xi1>
    %14 = vector.broadcast %2 : i32 to vector<40x1xi32>
    %15 = arith.addi %4, %14 : vector<40x1xi32>
    %16 = arith.select %13, %15, %4 : vector<40x1xi1>, vector<40x1xi32>
    %c0_i32_3 = arith.constant 0 : i32
    %17 = vector.broadcast %c0_i32_3 : i32 to vector<40x1xi32>
    %18 = arith.cmpi eq, %16, %17 : vector<40x1xi32>
    %c4_i32 = arith.constant 4 : i32
    %19 = vector.broadcast %c4_i32 : i32 to vector<40x1xi32>
    %20 = arith.cmpi eq, %16, %19 : vector<40x1xi32>
    %c0 = arith.constant 0 : index
    %c0_4 = arith.constant 0 : index
    %21 = vector.load %arg1[%c0, %c0_4] : memref<40x128xf32, #tpu.memory_space<vmem>>, vector<40x128xf32>
    %c0_5 = arith.constant 0 : index
    %c0_6 = arith.constant 0 : index
    %22 = vector.load %arg2[%c0_5, %c0_6] : memref<384x128xbf16, #tpu.memory_space<vmem>>, vector<384x128xbf16>
    %c0_7 = arith.constant 0 : index
    %c0_8 = arith.constant 0 : index
    %23 = vector.load %arg3[%c0_7, %c0_8] : memref<1x128xf32, #tpu.memory_space<vmem>>, vector<1x128xf32>
    %24 = vector.extract_strided_slice %21 {offsets = [0, 0], sizes = [1, 128], strides = [1, 1]} : vector<40x128xf32> to vector<1x128xf32>
    %25 = vector.extract_strided_slice %21 {offsets = [0, 0], sizes = [39, 128], strides = [1, 1]} : vector<40x128xf32> to vector<39x128xf32>
    %26 = tpu.concatenate %24, %25 in 0 : vector<1x128xf32>, vector<39x128xf32> -> vector<40x128xf32>
    %27 = vector.shape_cast %18 : vector<40x1xi1> to vector<40x1xi1>
    %28 = vector.broadcast %27 : vector<40x1xi1> to vector<40x128xi1>
    %29 = arith.select %28, %21, %26 : vector<40x128xi1>, vector<40x128xf32>
    %30 = vector.extract_strided_slice %21 {offsets = [1, 0], sizes = [39, 128], strides = [1, 1]} : vector<40x128xf32> to vector<39x128xf32>
    %31 = vector.extract_strided_slice %21 {offsets = [39, 0], sizes = [1, 128], strides = [1, 1]} : vector<40x128xf32> to vector<1x128xf32>
    %32 = tpu.concatenate %30, %31 in 0 : vector<39x128xf32>, vector<1x128xf32> -> vector<40x128xf32>
    %33 = vector.shape_cast %20 : vector<40x1xi1> to vector<40x1xi1>
    %34 = vector.broadcast %33 : vector<40x1xi1> to vector<40x128xi1>
    %35 = arith.select %34, %21, %32 : vector<40x128xi1>, vector<40x128xf32>
    %36 = tpu.concatenate %29, %21, %35 in 1 : vector<40x128xf32>, vector<40x128xf32>, vector<40x128xf32> -> vector<40x384xf32>
    %37 = arith.truncf %36 : vector<40x384xf32> to vector<40x384xbf16>
    %cst = arith.constant dense<0.000000e+00> : vector<40x128xf32>
    %38 = tpu.matmul %37, %22, %cst {dimension_numbers = #tpu.dot_dimension_numbers<[1], [0], [0], [1], [0, 0, 1, 1], [], []>} : vector<40x384xbf16>, vector<384x128xbf16>, vector<40x128xf32> -> vector<40x128xf32>
    %39 = vector.broadcast %23 : vector<1x128xf32> to vector<40x128xf32>
    %40 = arith.addf %38, %39 : vector<40x128xf32>
    %cst_9 = arith.constant 0.000000e+00 : f32
    %41 = vector.broadcast %cst_9 : f32 to vector<40x128xf32>
    %42 = arith.maximumf %40, %41 : vector<40x128xf32>
    %c0_10 = arith.constant 0 : index
    %c0_11 = arith.constant 0 : index
    %c0_12 = arith.constant 0 : index
    %43 = vector.load %arg4[%c0_10, %c0_11, %c0_12] : memref<2x384x128xbf16, #tpu.memory_space<vmem>>, vector<1x384x128xbf16>
    %44 = vector.shape_cast %43 : vector<1x384x128xbf16> to vector<384x128xbf16>
    %c0_13 = arith.constant 0 : index
    %c0_14 = arith.constant 0 : index
    %c0_15 = arith.constant 0 : index
    %45 = vector.load %arg5[%c0_13, %c0_14, %c0_15] : memref<2x1x128xf32, #tpu.memory_space<vmem>>, vector<1x1x128xf32>
    %46 = vector.shape_cast %45 : vector<1x1x128xf32> to vector<1x128xf32>
    %47 = vector.extract_strided_slice %42 {offsets = [0, 0], sizes = [1, 128], strides = [1, 1]} : vector<40x128xf32> to vector<1x128xf32>
    %48 = vector.extract_strided_slice %42 {offsets = [0, 0], sizes = [39, 128], strides = [1, 1]} : vector<40x128xf32> to vector<39x128xf32>
    %49 = tpu.concatenate %47, %48 in 0 : vector<1x128xf32>, vector<39x128xf32> -> vector<40x128xf32>
    %50 = vector.shape_cast %18 : vector<40x1xi1> to vector<40x1xi1>
    %51 = vector.broadcast %50 : vector<40x1xi1> to vector<40x128xi1>
    %52 = arith.select %51, %42, %49 : vector<40x128xi1>, vector<40x128xf32>
    %53 = vector.extract_strided_slice %42 {offsets = [1, 0], sizes = [39, 128], strides = [1, 1]} : vector<40x128xf32> to vector<39x128xf32>
    %54 = vector.extract_strided_slice %42 {offsets = [39, 0], sizes = [1, 128], strides = [1, 1]} : vector<40x128xf32> to vector<1x128xf32>
    %55 = tpu.concatenate %53, %54 in 0 : vector<39x128xf32>, vector<1x128xf32> -> vector<40x128xf32>
    %56 = vector.shape_cast %20 : vector<40x1xi1> to vector<40x1xi1>
    %57 = vector.broadcast %56 : vector<40x1xi1> to vector<40x128xi1>
    %58 = arith.select %57, %42, %55 : vector<40x128xi1>, vector<40x128xf32>
    %59 = tpu.concatenate %52, %42, %58 in 1 : vector<40x128xf32>, vector<40x128xf32>, vector<40x128xf32> -> vector<40x384xf32>
    %60 = arith.truncf %59 : vector<40x384xf32> to vector<40x384xbf16>
    %cst_16 = arith.constant dense<0.000000e+00> : vector<40x128xf32>
    %61 = tpu.matmul %60, %44, %cst_16 {dimension_numbers = #tpu.dot_dimension_numbers<[1], [0], [0], [1], [0, 0, 1, 1], [], []>} : vector<40x384xbf16>, vector<384x128xbf16>, vector<40x128xf32> -> vector<40x128xf32>
    %62 = vector.broadcast %46 : vector<1x128xf32> to vector<40x128xf32>
    %63 = arith.addf %61, %62 : vector<40x128xf32>
    %cst_17 = arith.constant 0.000000e+00 : f32
    %64 = vector.broadcast %cst_17 : f32 to vector<40x128xf32>
    %65 = arith.maximumf %63, %64 : vector<40x128xf32>
    %66 = arith.addf %42, %65 : vector<40x128xf32>
    %c1 = arith.constant 1 : index
    %c0_18 = arith.constant 0 : index
    %c0_19 = arith.constant 0 : index
    %67 = vector.load %arg4[%c1, %c0_18, %c0_19] : memref<2x384x128xbf16, #tpu.memory_space<vmem>>, vector<1x384x128xbf16>
    %68 = vector.shape_cast %67 : vector<1x384x128xbf16> to vector<384x128xbf16>
    %c1_20 = arith.constant 1 : index
    %c0_21 = arith.constant 0 : index
    %c0_22 = arith.constant 0 : index
    %69 = vector.load %arg5[%c1_20, %c0_21, %c0_22] : memref<2x1x128xf32, #tpu.memory_space<vmem>>, vector<1x1x128xf32>
    %70 = vector.shape_cast %69 : vector<1x1x128xf32> to vector<1x128xf32>
    %71 = vector.extract_strided_slice %66 {offsets = [0, 0], sizes = [1, 128], strides = [1, 1]} : vector<40x128xf32> to vector<1x128xf32>
    %72 = vector.extract_strided_slice %66 {offsets = [0, 0], sizes = [39, 128], strides = [1, 1]} : vector<40x128xf32> to vector<39x128xf32>
    %73 = tpu.concatenate %71, %72 in 0 : vector<1x128xf32>, vector<39x128xf32> -> vector<40x128xf32>
    %74 = vector.shape_cast %18 : vector<40x1xi1> to vector<40x1xi1>
    %75 = vector.broadcast %74 : vector<40x1xi1> to vector<40x128xi1>
    %76 = arith.select %75, %66, %73 : vector<40x128xi1>, vector<40x128xf32>
    %77 = vector.extract_strided_slice %66 {offsets = [1, 0], sizes = [39, 128], strides = [1, 1]} : vector<40x128xf32> to vector<39x128xf32>
    %78 = vector.extract_strided_slice %66 {offsets = [39, 0], sizes = [1, 128], strides = [1, 1]} : vector<40x128xf32> to vector<1x128xf32>
    %79 = tpu.concatenate %77, %78 in 0 : vector<39x128xf32>, vector<1x128xf32> -> vector<40x128xf32>
    %80 = vector.shape_cast %20 : vector<40x1xi1> to vector<40x1xi1>
    %81 = vector.broadcast %80 : vector<40x1xi1> to vector<40x128xi1>
    %82 = arith.select %81, %66, %79 : vector<40x128xi1>, vector<40x128xf32>
    %83 = tpu.concatenate %76, %66, %82 in 1 : vector<40x128xf32>, vector<40x128xf32>, vector<40x128xf32> -> vector<40x384xf32>
    %84 = arith.truncf %83 : vector<40x384xf32> to vector<40x384xbf16>
    %cst_23 = arith.constant dense<0.000000e+00> : vector<40x128xf32>
    %85 = tpu.matmul %84, %68, %cst_23 {dimension_numbers = #tpu.dot_dimension_numbers<[1], [0], [0], [1], [0, 0, 1, 1], [], []>} : vector<40x384xbf16>, vector<384x128xbf16>, vector<40x128xf32> -> vector<40x128xf32>
    %86 = vector.broadcast %70 : vector<1x128xf32> to vector<40x128xf32>
    %87 = arith.addf %85, %86 : vector<40x128xf32>
    %cst_24 = arith.constant 0.000000e+00 : f32
    %88 = vector.broadcast %cst_24 : f32 to vector<40x128xf32>
    %89 = arith.maximumf %87, %88 : vector<40x128xf32>
    %90 = arith.addf %66, %89 : vector<40x128xf32>
    %91 = vector.shape_cast %90 : vector<40x128xf32> to vector<8x5x128xf32>
    %92 = vector.extract_strided_slice %91 {offsets = [0, 0, 0], sizes = [8, 1, 128], strides = [1, 1, 1]} : vector<8x5x128xf32> to vector<8x1x128xf32>
    %93 = vector.shape_cast %92 : vector<8x1x128xf32> to vector<8x128xf32>
    %94 = vector.extract_strided_slice %91 {offsets = [0, 1, 0], sizes = [8, 1, 128], strides = [1, 1, 1]} : vector<8x5x128xf32> to vector<8x1x128xf32>
    %95 = vector.shape_cast %94 : vector<8x1x128xf32> to vector<8x128xf32>
    %96 = vector.extract_strided_slice %91 {offsets = [0, 2, 0], sizes = [8, 1, 128], strides = [1, 1, 1]} : vector<8x5x128xf32> to vector<8x1x128xf32>
    %97 = vector.shape_cast %96 : vector<8x1x128xf32> to vector<8x128xf32>
    %98 = vector.extract_strided_slice %91 {offsets = [0, 3, 0], sizes = [8, 1, 128], strides = [1, 1, 1]} : vector<8x5x128xf32> to vector<8x1x128xf32>
    %99 = vector.shape_cast %98 : vector<8x1x128xf32> to vector<8x128xf32>
    %100 = vector.extract_strided_slice %91 {offsets = [0, 4, 0], sizes = [8, 1, 128], strides = [1, 1, 1]} : vector<8x5x128xf32> to vector<8x1x128xf32>
    %101 = vector.shape_cast %100 : vector<8x1x128xf32> to vector<8x128xf32>
    %102 = tpu.concatenate %93, %95, %97, %99, %101 in 1 : vector<8x128xf32>, vector<8x128xf32>, vector<8x128xf32>, vector<8x128xf32>, vector<8x128xf32> -> vector<8x640xf32>
    %103 = arith.truncf %102 : vector<8x640xf32> to vector<8x640xbf16>
    %c0_25 = arith.constant 0 : index
    %c0_26 = arith.constant 0 : index
    %104 = vector.load %arg6[%c0_25, %c0_26] : memref<640x128xbf16, #tpu.memory_space<vmem>>, vector<640x128xbf16>
    %cst_27 = arith.constant dense<0.000000e+00> : vector<8x128xf32>
    %105 = tpu.matmul %103, %104, %cst_27 {dimension_numbers = #tpu.dot_dimension_numbers<[1], [0], [0], [1], [0, 0, 1, 1], [], []>} : vector<8x640xbf16>, vector<640x128xbf16>, vector<8x128xf32> -> vector<8x128xf32>
    %c0_28 = arith.constant 0 : index
    %c0_29 = arith.constant 0 : index
    %106 = vector.load %arg7[%c0_28, %c0_29] : memref<1x128xf32, #tpu.memory_space<vmem>>, vector<1x128xf32>
    %107 = vector.broadcast %106 : vector<1x128xf32> to vector<8x128xf32>
    %108 = arith.addf %105, %107 : vector<8x128xf32>
    %cst_30 = arith.constant 0.000000e+00 : f32
    %109 = vector.broadcast %cst_30 : f32 to vector<8x128xf32>
    %110 = arith.maximumf %108, %109 : vector<8x128xf32>
    %111 = arith.truncf %110 : vector<8x128xf32> to vector<8x128xbf16>
    %c0_31 = arith.constant 0 : index
    %c0_32 = arith.constant 0 : index
    %112 = vector.load %arg8[%c0_31, %c0_32] : memref<128x128xbf16, #tpu.memory_space<vmem>>, vector<128x128xbf16>
    %cst_33 = arith.constant dense<0.000000e+00> : vector<8x128xf32>
    %113 = tpu.matmul %111, %112, %cst_33 {dimension_numbers = #tpu.dot_dimension_numbers<[1], [0], [0], [1], [0, 0, 1, 1], [], []>} : vector<8x128xbf16>, vector<128x128xbf16>, vector<8x128xf32> -> vector<8x128xf32>
    %c0_34 = arith.constant 0 : index
    %c0_35 = arith.constant 0 : index
    %114 = vector.load %arg9[%c0_34, %c0_35] : memref<1x128xf32, #tpu.memory_space<vmem>>, vector<1x128xf32>
    %115 = vector.broadcast %114 : vector<1x128xf32> to vector<8x128xf32>
    %116 = arith.addf %113, %115 : vector<8x128xf32>
    %117 = arith.negf %116 : vector<8x128xf32>
    %118 = math.exp %117 : vector<8x128xf32>
    %cst_36 = arith.constant 1.000000e+00 : f32
    %119 = vector.broadcast %cst_36 : f32 to vector<8x128xf32>
    %120 = arith.addf %119, %118 : vector<8x128xf32>
    %121 = arith.divf %119, %120 : vector<8x128xf32>
    %c0_37 = arith.constant 0 : index
    %c0_38 = arith.constant 0 : index
    %122 = vector.load %arg10[%c0_37, %c0_38] : memref<8x128xf32, #tpu.memory_space<vmem>>, vector<8x128xf32>
    tpu.vector_store %arg10[%c0_37, %c0_38], %121 {strides = array<i32>} : memref<8x128xf32, #tpu.memory_space<vmem>>, vector<8x128xf32>,
    return
  }
  func.func @transform_0(%arg0: i32) -> (i32, i32) {
    %c0_i32 = arith.constant 0 : i32
    %c0_i32_0 = arith.constant 0 : i32
    return %arg0, %c0_i32 : i32, i32
  }
  func.func @transform_1(%arg0: i32) -> (i32, i32) {
    %c0_i32 = arith.constant 0 : i32
    %c0_i32_0 = arith.constant 0 : i32
    %c0_i32_1 = arith.constant 0 : i32
    return %c0_i32, %c0_i32_0 : i32, i32
  }
  func.func @transform_2(%arg0: i32) -> (i32, i32) {
    %c0_i32 = arith.constant 0 : i32
    %c0_i32_0 = arith.constant 0 : i32
    %c0_i32_1 = arith.constant 0 : i32
    return %c0_i32, %c0_i32_0 : i32, i32
  }
  func.func @transform_3(%arg0: i32) -> (i32, i32, i32) {
    %c0_i32 = arith.constant 0 : i32
    %c0_i32_0 = arith.constant 0 : i32
    %c0_i32_1 = arith.constant 0 : i32
    %c0_i32_2 = arith.constant 0 : i32
    return %c0_i32, %c0_i32_0, %c0_i32_1 : i32, i32, i32
  }
  func.func @transform_4(%arg0: i32) -> (i32, i32, i32) {
    %c0_i32 = arith.constant 0 : i32
    %c0_i32_0 = arith.constant 0 : i32
    %c0_i32_1 = arith.constant 0 : i32
    %c0_i32_2 = arith.constant 0 : i32
    return %c0_i32, %c0_i32_0, %c0_i32_1 : i32, i32, i32
  }
  func.func @transform_5(%arg0: i32) -> (i32, i32) {
    %c0_i32 = arith.constant 0 : i32
    %c0_i32_0 = arith.constant 0 : i32
    %c0_i32_1 = arith.constant 0 : i32
    return %c0_i32, %c0_i32_0 : i32, i32
  }
  func.func @transform_6(%arg0: i32) -> (i32, i32) {
    %c0_i32 = arith.constant 0 : i32
    %c0_i32_0 = arith.constant 0 : i32
    %c0_i32_1 = arith.constant 0 : i32
    return %c0_i32, %c0_i32_0 : i32, i32
  }
  func.func @transform_7(%arg0: i32) -> (i32, i32) {
    %c0_i32 = arith.constant 0 : i32
    %c0_i32_0 = arith.constant 0 : i32
    %c0_i32_1 = arith.constant 0 : i32
    return %c0_i32, %c0_i32_0 : i32, i32
  }
  func.func @transform_8(%arg0: i32) -> (i32, i32) {
    %c0_i32 = arith.constant 0 : i32
    %c0_i32_0 = arith.constant 0 : i32
    %c0_i32_1 = arith.constant 0 : i32
    return %c0_i32, %c0_i32_0 : i32, i32
  }
  func.func @transform_9(%arg0: i32) -> (i32, i32) {
    %c0_i32 = arith.constant 0 : i32
    %c0_i32_0 = arith.constant 0 : i32
    return %arg0, %c0_i32 : i32, i32
  }
}

</mosaic_0001>

<bundles_post_ra>
// kernel: tpu_custom_call.1
= control target key start
LH: loop header
LB: loop body
LE: loop exit
PB: predicated region body
PF: predicated region fallthrough
CT: control target
= control target key end

     0   :  { %s4564_s0 = inlined_call_operand.hbm [shape: f32[80,128], index: 0, kind: input, shape index: {}]   ;;  %s4565_s1 = inlined_call_operand.hbm [shape: bf16[384,128], index: 1, kind: input, shape index: {}]   ;;  %s4566_s2 = inlined_call_operand.vmem [shape: f32[1,128], index: 2, kind: input, shape index: {}]   ;;  %s4567_s3 = inlined_call_operand.hbm [shape: bf16[2,384,128], index: 3, kind: input, shape index: {}]   ;;  %s4568_s4 = inlined_call_operand.vmem [shape: f32[2,1,128], index: 4, kind: input, shape index: {}]   ;;  %s4569_s5 = inlined_call_operand.hbm [shape: bf16[640,128], index: 5, kind: input, shape index: {}]   ;;  %s4570_s6 = inlined_call_operand.vmem [shape: f32[1,128], index: 6, kind: input, shape index: {}]   ;;  %s4571_s7 = inlined_call_operand.hbm [shape: bf16[128,128], index: 7, kind: input, shape index: {}]   ;;  %s4572_s8 = inlined_call_operand.vmem [shape: f32[1,128], index: 8, kind: input, shape index: {}]   ;;  %s4573_s9 = inlined_call_operand.hbm [shape: f32[16,128], index: 9, kind: output, shape index: {}]  }
   0x1   :  { %4580 = sst [smem:[#allocation18_spill]] %s4573_s9 }
   0x2   :  { %14 = vsyncpa [#allocation3], 0 }
   0x3   :  { %16 = vsyncpa [#allocation3 + $0x1], 0 }
   0x4   :  { %17 = vsyncpa [#allocation6], 0 }
   0x5   :  { %18 = vsyncpa [#allocation9], 0 }
   0x6   :  { %19 = vsyncpa [#allocation4], 0 }
   0x7   :  { %21 = vsyncpa [#allocation4 + $0x1], 0  ;;  %s3834_s30 = smov 0   ;;  %s3836_s10 = smov 0  }
   0x8   :  { %s3838_s11 = smov 0   ;;  %s3840_s12 = smov 0  }
   0x9 LB: > { %4581 = sst [smem:[#allocation16_spill]] %s3757_s30  ;;  %s3855_s13 = sadd.s32 4294967295, %s3769_s12   ;;  %s3769_s12 = sphi %s3840_s12, %s4607_s12   ;;  %s3765_s11 = sphi %s3838_s11, %s4606_s11   ;;  %s3761_s10 = sphi %s3836_s10, %s4605_s10   ;;  %s3757_s30 = sphi %s3834_s30, %s4604_s30  }
   0xa   : > { %s2850_s14 = sadd.s32 4294967294, %s3769_s12   ;;  %p47_p0 = scmp.ne.s32.totalorder %s3761_s10, %s3757_s30 }
   0xb   : > { %p4574_p1 = scmp.eq.s32.totalorder %s3855_s13, 0  ;;  %p245_p3 = scmp.eq.s32.totalorder %s2850_s14, 1 }
   0xc   : > { %p2851_p5 = scmp.ge.s32.totalorder %s3769_s12, 1  ;;  %p252_p7 = scmp.lt.s32.totalorder %s3769_s12, 3 }
   0xd   : > { %p3864_p4 = por %p4574_p1, %p47_p0  ;;  %p3869_p6 = por %p245_p3, %p47_p0 }
   0xe   : > { %p3874_p8 = pnand %p2851_p5, %p252_p7  ;;  %s3771_s18 = smov [#allocation5]  }
   0xf   : > { %s4582_s15 = scalar_select %p3864_p4, 1, 0 }
  0x10   : > { %s4583_s16 = scalar_select %p3869_p6, 1, 0 }
  0x11   : > { %s4585_s17 = scalar_select %p3874_p8, 1, 0 }
  0x12   : > { %4584 = sst [smem:[#allocation17_spill]] %s4583_s16  ;;  %s264_s19 = sshll.u32 %s3771_s18, 4  ;;  %s3878_s19 = int_to_ptr.vmem [resolvable:$true] %s264_s19 }
  0x13   : > { %p3355_p9 = pneg %p3874_p8  ;;  %s3772_s21 = smov [#allocation8]  }
  0x14   : > { %s296_s22 = sshll.u32 %s3772_s21, 4  ;;  %s3773_s23 = smov [#allocation7]   ;;  %s3889_s22 = int_to_ptr.vmem [resolvable:$true] %s296_s22 }
  0x15   : > { %p3885_p11 = pnand %p3355_p9, %p4574_p1  ;;  %s3891_s24 = sshll.u32 %s3773_s23, 4  ;;  %s281_s24 = int_to_ptr.vmem [resolvable:$true] %s3891_s24 }
  0x16   : > { %s3553_s27 = scalar_lea.hbm %s4565_s1, 3072 }
  0x17   : > { %p3554_p12 = scmp.ne.s32.totalorder %s4565_s1, %s3553_s27  ;;  %p3901_p13 = pneg %p3885_p11 }
  0x18   : > { %p3560_p5 = scmp.lt.u32.totalorder %s3553_s27, %s4565_s1 }
  0x19   : > { %p3556_p0 = pnand %p3901_p13, %p3554_p12 }
  0x1b   : > { %p3557_p3 = pneg %p3556_p0 }
  0x1d   : > { %p3562_p7 = pnand %p3560_p5, %p3557_p3 }
  0x1f   : > { %3565 = shalt.err (!%p3562_p7)
}
  0x20   : > { %s3566_s23 = scalar_lea.vmem %s3878_s19, 3072  ;;  %p3574_p2 = scmp.lt.s32.totalorder %s3878_s19, %s3878_s19 }
  0x21   : > { %p3567_p9 = scmp.ne.s32.totalorder %s3878_s19, %s3566_s23  ;;  %p3575_p6 = scmp.lt.s32.totalorder %s3566_s23, %s3566_s23 }
  0x23   : > { %p3569_p10 = pnand %p3567_p9, %p3901_p13  ;;  %p3576_p12 = por %p3575_p6, %p3574_p2 }
  0x25   : > { %p3570_p1 = pneg %p3569_p10 }
  0x27   : > { %p3577_p0 = pnand %p3576_p12, %p3570_p1 }
  0x29   : > { %3580 = shalt.err (!%p3577_p0)
}
  0x2a   : > { %s3774_s25 = smov 64   ;;  %s3775_s26 = smov 4  }
  0x2b   : > { %3358 = dma.hbm_to_vmem [thread:$0]  (!%p3885_p11), %s4565_s1, 3072, %s3878_s19, [#allocation6], %s3774_s25, %s3774_s25, %s3775_s26  }
  0x2c   : > { %s3581_s21 = scalar_lea.hbm %s4569_s5, 5120 }
  0x2d   : > { %p3582_p1 = scmp.ne.s32.totalorder %s4569_s5, %s3581_s21  ;;  %p3588_p10 = scmp.lt.u32.totalorder %s3581_s21, %s4569_s5 }
  0x2f   : > { %p3584_p2 = pnand %p3582_p1, %p3901_p13 }
  0x31   : > { %p3585_p6 = pneg %p3584_p2 }
  0x33   : > { %p3590_p3 = pnand %p3588_p10, %p3585_p6 }
  0x35   : > { %3593 = shalt.err (!%p3590_p3)
}
  0x36   : > { %s3594_s19 = scalar_lea.vmem %s3889_s22, 5120  ;;  %p3602_p12 = scmp.lt.s32.totalorder %s3889_s22, %s3889_s22 }
  0x37   : > { %p3595_p5 = scmp.ne.s32.totalorder %s3889_s22, %s3594_s19  ;;  %p3603_p0 = scmp.lt.s32.totalorder %s3594_s19, %s3594_s19 }
  0x39   : > { %p3597_p7 = pnand %p3595_p5, %p3901_p13  ;;  %p3604_p1 = por %p3603_p0, %p3602_p12 }
  0x3b   : > { %p3598_p9 = pneg %p3597_p7 }
  0x3d   : > { %p3605_p2 = pnand %p3604_p1, %p3598_p9 }
  0x3f   : > { %3608 = shalt.err (!%p3605_p2)
}
  0x40   : > { %3364 = dma.hbm_to_vmem [thread:$0]  (!%p3885_p11), %s4569_s5, 5120, %s3889_s22, [#allocation9], %s3774_s25, %s3774_s25, %s3775_s26  }
  0x41   : > { %s3609_s28 = scalar_lea.hbm %s4567_s3, 6144 }
  0x42   : > { %p3610_p6 = scmp.ne.s32.totalorder %s4567_s3, %s3609_s28  ;;  %p3616_p5 = scmp.lt.u32.totalorder %s3609_s28, %s4567_s3 }
  0x44   : > { %p3612_p10 = pnand %p3610_p6, %p3901_p13 }
  0x46   : > { %p3613_p3 = pneg %p3612_p10 }
  0x48   : > { %p3618_p7 = pnand %p3616_p5, %p3613_p3 }
  0x4a   : > { %3621 = shalt.err (!%p3618_p7)
}
  0x4b   : > { %s3622_s19 = scalar_lea.vmem %s281_s24, 6144  ;;  %p3630_p1 = scmp.lt.s32.totalorder %s281_s24, %s281_s24 }
  0x4c   : > { %p3623_p9 = scmp.ne.s32.totalorder %s281_s24, %s3622_s19  ;;  %p3631_p2 = scmp.lt.s32.totalorder %s3622_s19, %s3622_s19 }
  0x4e   : > { %p3625_p12 = pnand %p3623_p9, %p3901_p13  ;;  %p3632_p4 = por %p3631_p2, %p3630_p1 }
  0x50   : > { %p3626_p0 = pneg %p3625_p12 }
  0x52   : > { %p3633_p8 = pnand %p3632_p4, %p3626_p0 }
  0x54   : > { %3636 = shalt.err (!%p3633_p8)
}
  0x55   : > { %3361 = dma.hbm_to_vmem [thread:$0]  (!%p3885_p11), %s4567_s3, 6144, %s281_s24, [#allocation6], %s3774_s25, %s3774_s25, %s3775_s26  }
  0x56   : > { %s3776_s30 = smov [#allocation10]   ;;  %s3637_s29 = scalar_lea.hbm %s4571_s7, 1024 }
  0x57   : > { %s312_s16 = sshll.u32 %s3776_s30, 4  ;;  %p3638_p4 = scmp.ne.s32.totalorder %s4571_s7, %s3637_s29  ;;  %s313_s16 = int_to_ptr.vmem [resolvable:$true] %s312_s16 }
  0x58   : > { %p3644_p10 = scmp.lt.u32.totalorder %s3637_s29, %s4571_s7 }
  0x59   : > { %p3640_p8 = pnand %p3638_p4, %p3901_p13 }
  0x5b   : > { %p3641_p6 = pneg %p3640_p8 }
  0x5d   : > { %p3646_p3 = pnand %p3644_p10, %p3641_p6 }
  0x5f   : > { %3649 = shalt.err (!%p3646_p3)
}
  0x60   : > { %s3650_s24 = scalar_lea.vmem %s313_s16, 1024  ;;  %p3658_p12 = scmp.lt.s32.totalorder %s313_s16, %s313_s16 }
  0x61   : > { %p3651_p5 = scmp.ne.s32.totalorder %s313_s16, %s3650_s24  ;;  %p3659_p0 = scmp.lt.s32.totalorder %s3650_s24, %s3650_s24 }
  0x63   : > { %p3653_p7 = pnand %p3651_p5, %p3901_p13  ;;  %p3660_p1 = por %p3659_p0, %p3658_p12 }
  0x65   : > { %p3654_p9 = pneg %p3653_p7 }
  0x67   : > { %p3661_p2 = pnand %p3660_p1, %p3654_p9 }
  0x69   : > { %3664 = shalt.err (!%p3661_p2)
}
  0x6a   : > { %3367 = dma.hbm_to_vmem [thread:$0]  (!%p3885_p11), %s4571_s7, 1024, %s313_s16, [#allocation9], %s3774_s25, %s3774_s25, %s3775_s26  }
  0x6b   : > { %s3995_s14 = sadd.s32 1, %s3769_s12   ;;  %s34_s20 = sadd.s32 1, %s3765_s11 }
  0x6c   : > { %s31_s30 = ssub.s32 %s3769_s12, %s3995_s14  ;;  %p41_p13 = scmp.ne.s32.totalorder %s3765_s11, %s3761_s10 }
  0x6d   : > { %p32_p4 = scmp.eq.s32.totalorder %s31_s30, 0  ;;  %p42_p8 = scmp.eq.s32.totalorder %s3769_s12, 0 }
  0x6e   : > { %p4588_p6 = scmp.eq.s32.totalorder %s3855_s13, 1  ;;  %p3380_p3 = scmp.lt.s32.totalorder %s3769_s12, 2 }
  0x6f   : > { %s4011_s28 = scalar_select %p32_p4, %s3765_s11, %s34_s20  }
  0x70   : > { %p4005_p10 = por %p4588_p6, %p41_p13  ;;  %p43_p5 = por %p42_p8, %p41_p13 }
  0x71   : > { %s329_s29 = sand.u32 1, %s3765_s11   ;;  %s3001_s25 = smul.u32 640, %s3769_s12 }
  0x72   : > { %s3323_s18 = smul.u32 40, %s329_s29  ;;  %p4015_p11 = pnand %p3380_p3, %p43_p5 }
  0x73   : > { %s4022_s23 = scalar_lea.hbm %s4564_s0, %s3001_s25  ;;  %s4026_s22 = scalar_lea.sflag [#allocation3], %s329_s29 }
  0x74   : > { %s333_s19 = scalar_lea.vmem [#allocation2], %s3323_s18  ;;  %s3665_s9 = scalar_lea.hbm %s4022_s23, 640 }
  0x75   : > { %s340_s24 = sshll.u32 %s333_s19, 4  ;;  %p3666_p7 = scmp.ne.s32.totalorder %s4022_s23, %s3665_s9  ;;  %s4024_s24 = int_to_ptr.vmem [resolvable:$true] %s340_s24 }
  0x76   : > { %p3667_p9 = pneg %p4015_p11  ;;  %s3670_s25 = scalar_lea.hbm %s4564_s0, 1280 }
  0x77   : > { %p3671_p1 = scmp.lt.u32.totalorder %s4022_s23, %s4564_s0  ;;  %p3672_p2 = scmp.lt.u32.totalorder %s3670_s25, %s3665_s9 }
  0x78   : > { %p3668_p12 = pnand %p3667_p9, %p3666_p7  ;;  %p3674_p4 = scmp.lt.u32.totalorder %s3665_s9, %s4022_s23 }
  0x79   : > { %p3673_p13 = por %p3672_p2, %p3671_p1 }
  0x7a   : > { %p3669_p0 = pneg %p3668_p12 }
  0x7b   : > { %p3675_p8 = por %p3674_p4, %p3673_p13 }
  0x7d   : > { %p3676_p6 = pnand %p3675_p8, %p3669_p0 }
  0x7f   : > { %3679 = shalt.err (!%p3676_p6)
}
  0x80   : > { %s3680_s29 = scalar_lea.vmem %s4024_s24, 640  ;;  %s3777_s18 = smov [#allocation2]  }
  0x81   : > { %p3681_p3 = scmp.ne.s32.totalorder %s4024_s24, %s3680_s29  ;;  %s3685_s19 = sshll.u32 %s3777_s18, 4  ;;  %s3686_s19 = int_to_ptr.vmem [resolvable:$false] %s3685_s19 }
  0x82   : > { %s3687_s20 = scalar_lea.vmem %s3686_s19, 1280  ;;  %p3688_p12 = scmp.lt.s32.totalorder %s4024_s24, %s3686_s19 }
  0x83   : > { %p3683_p5 = pnand %p3681_p3, %p3667_p9  ;;  %p3689_p1 = scmp.lt.s32.totalorder %s3687_s20, %s3680_s29 }
  0x85   : > { %p3684_p7 = pneg %p3683_p5  ;;  %p3690_p2 = por %p3689_p1, %p3688_p12 }
  0x87   : > { %p3691_p13 = pnand %p3690_p2, %p3684_p7 }
  0x89   : > { %3694 = shalt.err (!%p3691_p13)
}
  0x8a   : > { %s3778_s9 = smov 128   ;;  %s3779_s30 = smov 8  }
  0x8b   : > { %3371 = dma.hbm_to_vmem [thread:$0]  (!%p4015_p11), %s4022_s23, 640, %s4024_s24, %s4026_s22, %s3778_s9, %s3778_s9, %s3779_s30  }
  0x8c   : > { %p4591_p9 = scmp.ne.s32.totalorder %s4585_s17, 0 }
  0x8d   : > { %s4057_s25 = sand.u32 (!%p4591_p9), 1, %s3761_s10   ;;  %p4592_p0 = scmp.ne.s32.totalorder (!%p4591_p9), %s4582_s15, 0 }
  0x8e   : > { %352 = sbr.rel (%p4591_p9) target bundleno = 1424 (0x590), region = 56  ;;  %s355_s21 = scalar_lea.sflag (!%p4591_p9), [#allocation3], %s4057_s25 }
  0x8f   : > { %s3324_s16 = smul.u32 (!%p4591_p9), 40, %s4057_s25 }
  0x91   : > { %s4061_s29 = scalar_lea.vmem (!%p4591_p9), [#allocation2], %s3324_s16 }
  0x95   : > { %3740 = dma.done.wait (%p4592_p0), %s355_s21, 640  }
  0x96   : > { %3742 = vsyncadd (%p4592_p0), %s355_s21, 4294966656  ;;  %p4593_p11 = scmp.eq.s32.totalorder %s3855_s13, 0 }
  0x98   : > { %3744 = dma.done.wait (%p4593_p11), [#allocation6], 9216   ;;  %p4594_p4 = pmov %p4593_p11 }
  0x9a   : > { %3746 = vsyncadd (%p4594_p4), [#allocation6], 4294958080  ;;  %p4595_p8 = pmov %p4594_p4 }
  0x9b   : > { %p4596_p6 = pmov %p4594_p4 }
  0x9c   : > { %3748 = dma.done.wait (%p4595_p8), [#allocation9], 6144  }
  0x9d   : > { %3750 = vsyncadd (%p4596_p6), [#allocation9], 4294961152  ;;  %v411_v0 = vlaneseq  ;;  %v3780_v1 = vmov 0.0   ;;  %vm3781_vm0 = vmmov 0   ;;  %v3429_v11 = vld [vmem:[#allocation5 + $0x40] sm:$0xff]   ;;  %v3432_v14 = vld [vmem:[#allocation5 + $0x48] sm:$0xff]  }
  0x9e   : > { %3199 = vmatprep.subr.bf16.mxu1 %v3780_v1  ;;  %3215 = vmatprep.mubr.msk.bf16.mxu1 %vm3781_vm0, %v3780_v1  ;;  %v3430_v12 = vld [vmem:[#allocation5] sm:$0xff]   ;;  %v3433_v16 = vld [vmem:[#allocation5 + $0x8] sm:$0xff]   ;;  %v3435_v19 = vld [vmem:[#allocation5 + $0x50] sm:$0xff]   ;;  %vm566_vm2 = vcmask 1040384   ;;  %vm597_vm5 = vcmask 1046528   ;;  %s2863_s30 = sshll.u32 %s4057_s25, 3 }
  0x9f   : > { %v4076_v2 = vshrl.u32 %v411_v0, 7  ;;  %3002 = vmatprep.subr.bf16.mxu0 %v3429_v11  ;;  %v3431_v13 = vld [vmem:[#allocation5 + $0x80] sm:$0xff]   ;;  %v3434_v17 = vld [vmem:[#allocation5 + $0x88] sm:$0xff]   ;;  %v3436_v20 = vld [vmem:[#allocation5 + $0x10] sm:$0xff]   ;;  %s2998_s16 = sshll.u32 %s3855_s13, 7  ;;  %s408_s21 = scalar_lea.vmem [#allocation11], %s2863_s30 }
  0xa0   : > { %3003 = vmatpush3.bf16.msra.mxu0 %v3430_v12  ;;  %3200 = vmatpush3.bf16.msra.mxu1 %v3431_v13  ;;  %v3437_v22 = vld [vmem:[#allocation5 + $0x90] sm:$0xff]   ;;  %v3438_v24 = vld [vmem:[#allocation5 + $0x58] sm:$0xff]   ;;  %v3441_v29 = vld [vmem:[#allocation5 + $0x60] sm:$0xff]   ;;  %s4599_s26 = sld [smem:[#allocation18_spill]]  ;;  %s2729_s24 = scalar_lea.sflag [#allocation4], %s4057_s25 }
  0xa1   : > { %v413_v3 = vadd.s32 8, %v4076_v2  ;;  %v4082_v4 = vmul.u32.u64.low 3435973837, %v4076_v2  ;;  %v4083_v5 = vmul.u32.u64.high 3435973837, %v4076_v2, %v4082_v4  ;;  %v414_v6 = vadd.s32 16, %v4076_v2  ;;  %3004 = vmatprep.subr.bf16.mxu0 %v3432_v14  ;;  %3201 = vmatprep.subr.bf16.mxu1 %v3780_v1  ;;  %v3439_v26 = vld [vmem:[#allocation5 + $0x18] sm:$0xff]   ;;  %v3442_v33 = vld [vmem:[#allocation5 + $0x20] sm:$0xff]  }
  0xa2   : > { %v3440_v27 = vld [vmem:[#allocation5 + $0x98] sm:$0xff]   ;;  %v4100_v31 = vadd.s32 24, %v4076_v2  ;;  %v4103_v34 = vadd.s32 32, %v4076_v2  ;;  %v3443_v35 = vld [vmem:[#allocation5 + $0xa0] sm:$0xff]   ;;  %v3444_v36 = vld [vmem:[#allocation5 + $0x68] sm:$0xff]   ;;  %s3783_s13 = smov [#allocation11]  }
  0xa3   : > { %v4086_v7 = vmul.u32.u64.low 3435973837, %v413_v3  ;;  %v4087_v8 = vmul.u32.u64.high 3435973837, %v413_v3, %v4086_v7  ;;  %v4089_v9 = vmul.u32.u64.low 3435973837, %v414_v6  ;;  %v4090_v10 = vmul.u32.u64.high 3435973837, %v414_v6, %v4089_v9  ;;  %v3445_v39 = vld [vmem:[#allocation5 + $0x28] sm:$0xff]   ;;  %v3447_v42 = vld [vmem:[#allocation5 + $0x70] sm:$0xff]  }
  0xa4   : > { %v423_v15 = vshrl.u32 %v4083_v5, 2  ;;  %3005 = vmatpush3.bf16.msra.mxu0 %v3433_v16  ;;  %3202 = vmatpush3.bf16.msra.mxu1 %v3434_v17  ;;  %v3446_v40 = vld [vmem:[#allocation5 + $0xa8] sm:$0xff]   ;;  %v3448_v43 = vld [vmem:[#allocation5 + $0x30] sm:$0xff]   ;;  %v4114_v47 = vld [vmem:[%s4061_s29 + $0x8] sm:$0xff]  ;;  %v4117_v48 = vmul.u32.u64.low 3435973837, %v4100_v31  ;;  %v4118_v49 = vmul.u32.u64.high 3435973837, %v4100_v31, %v4117_v48 }
  0xa5   : > { %v434_v18 = vshrl.u32 %v4087_v8, 2  ;;  %3006 = vmatprep.subr.bf16.mxu0 %v3435_v19  ;;  %v445_v23 = vshrl.u32 %v4090_v10, 2  ;;  %3203 = vmatprep.subr.bf16.mxu1 %v3780_v1  ;;  %v3449_v44 = vld [vmem:[#allocation5 + $0xb0] sm:$0xff]   ;;  %v3450_v50 = vld [vmem:[#allocation5 + $0x78] sm:$0xff]   ;;  %v568_v53 = vrot.slane %v4114_v47, 7  ;;  %v4130_v57 = vld [vmem:[%s4061_s29 + $0x10] sm:$0xff] }
  0xa6   : > { %v424_v21 = vmul.u32 5, %v423_v15  ;;  %v507_v46 = vld [vmem:[%s4061_s29] sm:$0xff]  ;;  %v599_v58 = vrot.slane %v4114_v47, 1  ;;  %v4134_v59 = vmul.u32.u64.low 3435973837, %v4103_v34  ;;  %v4135_v60 = vmul.u32.u64.high 3435973837, %v4103_v34, %v4134_v59  ;;  %v4156_v5 = vld [vmem:[%s4061_s29 + $0x18] sm:$0xff]  ;;  %s4520_s23 = scalar_lea.hbm %s4599_s26, %s2998_s16 }
  0xa7   : > { %v435_v25 = vmul.u32 5, %v434_v18  ;;  %v446_v32 = vmul.u32 5, %v445_v23  ;;  %v629_v51 = vpack.c.bf16 %v4114_v47, %v507_v46  ;;  %v567_v52 = vrot.slane %v507_v46, 7  ;;  %v3451_v55 = vld [vmem:[#allocation5 + $0x38] sm:$0xff]   ;;  %v3453_v9 = vld [vmem:[#allocation7 + $0x40] sm:$0xff]   ;;  %v3455_v23 = vld [vmem:[#allocation7 + $0x48] sm:$0xff]  }
  0xa8   : > { %3007 = vmatpush3.bf16.msra.mxu0 %v3436_v20  ;;  %v425_v28 = vsub.s32 %v4076_v2, %v424_v21  ;;  %3204 = vmatpush3.bf16.msra.mxu1 %v3437_v22  ;;  %v598_v54 = vrot.slane %v507_v46, 1  ;;  %v3452_v61 = vld [vmem:[#allocation5 + $0xb8] sm:$0xff]   ;;  %v601_v8 = vrot.slane %v4130_v57, 1  ;;  %v632_v11 = vpack.c.bf16 %v4156_v5, %v4130_v57  ;;  %v3454_v18 = vld [vmem:[#allocation7] sm:$0xff]   ;;  %s3699_s18 = sshll.u32 %s3783_s13, 4  ;;  %s3700_s18 = int_to_ptr.vmem [resolvable:$false] %s3699_s18 }
  0xa9   : > { %3008 = vmatprep.subr.bf16.mxu0 %v3438_v24  ;;  %3205 = vmatprep.subr.bf16.mxu1 %v3780_v1  ;;  %v436_v30 = vsub.s32 %v413_v3, %v435_v25  ;;  %v4105_v37 = vsub.s32 %v414_v6, %v446_v32  ;;  %v569_v63 = vsel %vm566_vm2, %v567_v52, %v568_v53  ;;  %v456_v12 = vshrl.u32 %v4118_v49, 2  ;;  %v4175_v14 = vld [vmem:[%s4061_s29 + $0x20] sm:$0xff]  ;;  %v3456_v32 = vld [vmem:[#allocation7 + $0x8] sm:$0xff]   ;;  %s2742_s29 = sshll.u32 %s408_s21, 4  ;;  %s3701_s19 = scalar_lea.vmem %s3700_s18, 256  ;;  %s4522_s29 = int_to_ptr.vmem [resolvable:$true] %s2742_s29 }
  0xaa   : > { %vm472_vm1 = vcmp.ne.s32.totalorder %v425_v28, 0  ;;  %vm477_vm3 = vcmp.lt.s32.totalorder %v425_v28, 0  ;;  %v487_v38 = vadd.s32 5, %v425_v28  ;;  %819 = vmatprep.mubr.bf16.mxu0 %v629_v51  ;;  %v581_v0 = vsel %vm566_vm2, %v507_v46, %v567_v52  ;;  %v3461_v48 = vld [vmem:[#allocation7 + $0x58] sm:$0xff]   ;;  %v3467_v3 = vld [vmem:[#allocation7 + $0x68] sm:$0xff]   ;;  %s3695_s22 = scalar_lea.vmem %s4522_s29, 128  ;;  %p3702_p12 = scmp.lt.s32.totalorder %s4522_s29, %s3700_s18 }
  0xab   : > { %vm473_vm4 = vcmp.ne.s32.totalorder %v436_v30, 0  ;;  %vm478_vm6 = vcmp.lt.s32.totalorder %v436_v30, 0  ;;  %v488_v41 = vadd.s32 5, %v436_v30  ;;  %vm474_vm7 = vcmp.ne.s32.totalorder %v4105_v37, 0  ;;  %vm482_vm9 = vmand %vm477_vm3, %vm472_vm1  ;;  %p3696_p3 = scmp.ne.s32.totalorder %s4522_s29, %s3695_s22  ;;  %p3703_p1 = scmp.lt.s32.totalorder %s3701_s19, %s3695_s22 }
  0xac   : > { %3009 = vmatpush3.bf16.msra.mxu0 %v3439_v26  ;;  %3206 = vmatpush3.bf16.msra.mxu1 %v3440_v27  ;;  %vm479_vm8 = vcmp.lt.s32.totalorder %v4105_v37, 0  ;;  %v489_v45 = vadd.s32 5, %v4105_v37  ;;  %vm483_vm10 = vmand %vm478_vm6, %vm473_vm4  ;;  %v4127_v56 = vsel %vm482_vm9, %v487_v38, %v425_v28  ;;  %v600_v7 = vsel %vm597_vm5, %v598_v54, %v599_v58  ;;  %v3457_v26 = vld [vmem:[#allocation7 + $0x80] sm:$0xff]  }
  0xad   : > { %3010 = vmatprep.subr.bf16.mxu0 %v3441_v29  ;;  %3207 = vmatprep.subr.bf16.mxu1 %v3780_v1  ;;  %v4137_v62 = vsel %vm483_vm10, %v488_v41, %v436_v30  ;;  %vm497_vm11 = vcmp.eq.s32.totalorder %v4127_v56, 0  ;;  %vm4146_vm12 = vmand %vm479_vm8, %vm474_vm7  ;;  %vm502_vm14 = vcmp.eq.s32.totalorder %v4127_v56, 4  ;;  %v602_v16 = vsel %vm597_vm5, %v599_v58, %v601_v8  ;;  %p3697_p5 = pnand %p3696_p3, %p4005_p10  ;;  %p3704_p2 = por %p3703_p1, %p3702_p12 }
  0xae   : > { %vm498_vm13 = vcmp.eq.s32.totalorder %v4137_v62, 0  ;;  %v592_v4 = vsel %vm497_vm11, %v507_v46, %v581_v0  ;;  %vm503_vm15 = vcmp.eq.s32.totalorder %v4137_v62, 4  ;;  %v623_v10 = vsel %vm502_vm14, %v507_v46, %v600_v7  ;;  %v3466_v0 = vld [vmem:[#allocation7 + $0x98] sm:$0xff]   ;;  %v3471_v7 = vld [vmem:[#allocation7 + $0x30] sm:$0xff]  }
  0xaf   : > { %v593_v6 = vsel %vm498_vm13, %v4114_v47, %v569_v63  ;;  %v4172_v13 = vsel %vm4146_vm12, %v489_v45, %v4105_v37  ;;  %v570_v17 = vrot.slane %v4130_v57, 7  ;;  %v624_v19 = vsel %vm503_vm15, %v4114_v47, %v602_v16  ;;  %v3465_v63 = vld [vmem:[#allocation7 + $0x20] sm:$0xff]   ;;  %p3698_p7 = pneg %p3697_p5 }
  0xb0   : > { %3011 = vmatpush3.bf16.msra.mxu0 %v3442_v33  ;;  %3208 = vmatpush3.bf16.msra.mxu1 %v3443_v35  ;;  %v628_v15 = vpack.c.bf16 %v593_v6, %v592_v4  ;;  %vm499_vm1 = vcmp.eq.s32.totalorder %v4172_v13, 0  ;;  %v457_v20 = vmul.u32 5, %v456_v12  ;;  %v572_v21 = vrot.slane %v4156_v5, 7  ;;  %v3458_v35 = vld [vmem:[#allocation7 + $0x50] sm:$0xff]   ;;  %v3468_v4 = vld [vmem:[#allocation7 + $0x28] sm:$0xff]   ;;  %v3476_v12 = vld [vmem:[#allocation7 + $0xb8] sm:$0xff]  }
  0xb1   : > { %3012 = vmatprep.subr.bf16.mxu0 %v3444_v36  ;;  %3209 = vmatprep.subr.bf16.mxu1 %v3780_v1  ;;  %v603_v22 = vrot.slane %v4156_v5, 1  ;;  %v630_v24 = vpack.c.bf16 %v624_v19, %v623_v10  ;;  %v605_v25 = vrot.slane %v4175_v14, 1  ;;  %v571_v28 = vsel %vm566_vm2, %v568_v53, %v570_v17  ;;  %v3460_v36 = vld [vmem:[#allocation7 + $0x88] sm:$0xff]   ;;  %v3462_v53 = vld [vmem:[#allocation7 + $0x18] sm:$0xff]   ;;  %v3470_v6 = vld [vmem:[#allocation7 + $0x70] sm:$0xff]   ;;  %p3705_p13 = pnand %p3704_p2, %p3698_p7 }
  0xb2   : > { %v458_v27 = vsub.s32 %v4100_v31, %v457_v20  ;;  %vm504_vm3 = vcmp.eq.s32.totalorder %v4172_v13, 4  ;;  %v467_v30 = vshrl.u32 %v4135_v60, 2  ;;  %v573_v31 = vsel %vm566_vm2, %v570_v17, %v572_v21  ;;  %v3463_v60 = vld [vmem:[#allocation7 + $0x90] sm:$0xff]   ;;  %v3474_v10 = vld [vmem:[#allocation7 + $0x38] sm:$0xff]  }
  0xb3   : > { %v604_v29 = vsel %vm597_vm5, %v601_v8, %v603_v22  ;;  %v606_v37 = vsel %vm597_vm5, %v603_v22, %v605_v25  ;;  %v635_v47 = vpack.c.bf16 %v4175_v14, %v4175_v14  ;;  %v612_v52 = vsel %vm597_vm5, %v605_v25, %v4175_v14  ;;  %v3472_v8 = vld [vmem:[#allocation7 + $0xa8] sm:$0xff]   ;;  %v2864_v17 = vld [vmem:[%s4566_s2] ss:$0 sm:$0xff] }
  0xb4   : > { %3013 = vmatpush3.bf16.msra.mxu0 %v3445_v39  ;;  %3210 = vmatpush3.bf16.msra.mxu1 %v3446_v40  ;;  %vm475_vm4 = vcmp.ne.s32.totalorder %v458_v27, 0  ;;  %vm480_vm6 = vcmp.lt.s32.totalorder %v458_v27, 0  ;;  %v490_v33 = vadd.s32 5, %v458_v27  ;;  %v468_v38 = vmul.u32 5, %v467_v30 }
  0xb5   : > { %3014 = vmatprep.subr.bf16.mxu0 %v3447_v42  ;;  %3211 = vmatprep.subr.bf16.mxu1 %v3780_v1  ;;  %vm485_vm7 = vmand %vm480_vm6, %vm475_vm4  ;;  %v594_v40 = vsel %vm499_vm1, %v4130_v57, %v571_v28  ;;  %v625_v41 = vsel %vm504_vm3, %v4130_v57, %v604_v29 }
  0xb6   : > { %v4196_v39 = vsel %vm485_vm7, %v490_v33, %v458_v27  ;;  %v469_v42 = vsub.s32 %v4103_v34, %v468_v38 }
  0xb7   : > { %vm500_vm8 = vcmp.eq.s32.totalorder %v4196_v39, 0  ;;  %vm505_vm9 = vcmp.eq.s32.totalorder %v4196_v39, 4 }
  0xb8   : > { %3015 = vmatpush3.bf16.msra.mxu0 %v3448_v43  ;;  %3212 = vmatpush3.bf16.msra.mxu1 %v3449_v44  ;;  %v574_v43 = vrot.slane %v4175_v14, 7  ;;  %v3459_v44 = vld [vmem:[#allocation7 + $0x10] sm:$0xff]   ;;  %v595_v45 = vsel %vm500_vm8, %v4156_v5, %v573_v31  ;;  %v626_v46 = vsel %vm505_vm9, %v4156_v5, %v606_v37  ;;  %vm476_vm10 = vcmp.ne.s32.totalorder %v469_v42, 0  ;;  %v3469_v5 = vld [vmem:[#allocation7 + $0xa0] sm:$0xff]  }
  0xb9   : > { %3016 = vmatprep.subr.bf16.mxu0 %v3450_v50  ;;  %3213 = vmatprep.subr.bf16.mxu1 %v3780_v1  ;;  %v631_v49 = vpack.c.bf16 %v595_v45, %v594_v40  ;;  %v633_v50 = vpack.c.bf16 %v626_v46, %v625_v41  ;;  %vm481_vm12 = vcmp.lt.s32.totalorder %v469_v42, 0  ;;  %v491_v34 = vadd.s32 5, %v469_v42 }
  0xba   : > { %vm486_vm4 = vmand %vm481_vm12, %vm476_vm10  ;;  %v575_v51 = vsel %vm566_vm2, %v572_v21, %v574_v43 }
  0xbb   : > { %v4221_v54 = vsel %vm486_vm4, %v491_v34, %v469_v42 }
  0xbc   : > { %3017 = vmatpush3.bf16.msra.mxu0 %v3451_v55  ;;  %3214 = vmatpush3.bf16.msra.mxu1 %v3452_v61  ;;  %vm501_vm6 = vcmp.eq.s32.totalorder %v4221_v54, 0  ;;  %vm506_vm7 = vcmp.eq.s32.totalorder %v4221_v54, 4  ;;  %v3464_v61 = vld [vmem:[#allocation7 + $0x60] sm:$0xff]   ;;  %v3510_v54 = vld [vmem:[#allocation8 + $0x10] sm:$0xff]  }
  0xbd   : > { %3047 = vmatprep.subr.bf16.mxu0 %v3453_v9  ;;  %3227 = vmatprep.subr.bf16.mxu1 %v3780_v1  ;;  %v596_v55 = vsel %vm501_vm6, %v4175_v14, %v575_v51  ;;  %v627_v57 = vsel %vm506_vm7, %v4175_v14, %v612_v52  ;;  %v3473_v9 = vld [vmem:[#allocation7 + $0x78] sm:$0xff]   ;;  %v3477_v14 = vld [vmem:[#allocation7 + $0x100] sm:$0xff]  }
  0xbe   : > { %v634_v58 = vpack.c.bf16 %v596_v55, %v596_v55  ;;  %v636_v59 = vpack.c.bf16 %v627_v57, %v627_v57  ;;  %v3478_v57 = vld [vmem:[#allocation7 + $0xc0] sm:$0xff]  }
  0xbf   : > { %820 = vmatmul.mubr.bf16.vlgmr.msra.gmra.mrb[0].mxu0 %v628_v15  ;;  %3216 = vmatmul.mubr.bf16.vlgmr.msra.gmra.mrb[0].mxu1 %v630_v24 }
  0xc0   : > { %827 = vmatprep.mubr.bf16.mxu0 %v632_v11  ;;  %3219 = vmatprep.mubr.msk.bf16.mxu1 %vm3781_vm0, %v3780_v1  ;;  %v3475_v11 = vld [vmem:[#allocation7 + $0xb0] sm:$0xff]  }
  0xc1   : > { %3048 = vmatpush3.bf16.msra.mxu0 %v3454_v18  ;;  %3228 = vmatpush3.bf16.msra.mxu1 %v3457_v26 }
  0xc2   : > { %3049 = vmatprep.subr.bf16.mxu0 %v3455_v23  ;;  %3229 = vmatprep.subr.bf16.mxu1 %v3780_v1 }
  0xc5   : > { %3050 = vmatpush3.bf16.msra.mxu0 %v3456_v32  ;;  %3230 = vmatpush3.bf16.msra.mxu1 %v3460_v36 }
  0xc6   : > { %3051 = vmatprep.subr.bf16.mxu0 %v3458_v35  ;;  %3231 = vmatprep.subr.bf16.mxu1 %v3780_v1 }
  0xc7   : > { %828 = vmatmul.mubr.bf16.gmra.mrb[4].mxu0 %v631_v49  ;;  %3220 = vmatmul.mubr.bf16.gmra.mrb[4].mxu1 %v633_v50 }
  0xc8   : > { %835 = vmatprep.mubr.bf16.mxu0 %v635_v47  ;;  %3223 = vmatprep.mubr.msk.bf16.mxu1 %vm3781_vm0, %v3780_v1 }
  0xc9   : > { %3052 = vmatpush3.bf16.msra.mxu0 %v3459_v44  ;;  %3232 = vmatpush3.bf16.msra.mxu1 %v3463_v60 }
  0xca   : > { %3053 = vmatprep.subr.bf16.mxu0 %v3461_v48  ;;  %3233 = vmatprep.subr.bf16.mxu1 %v3780_v1 }
  0xcd   : > { %3054 = vmatpush3.bf16.msra.mxu0 %v3462_v53  ;;  %3234 = vmatpush3.bf16.msra.mxu1 %v3466_v0 }
  0xce   : > { %3055 = vmatprep.subr.bf16.mxu0 %v3464_v61  ;;  %3235 = vmatprep.subr.bf16.mxu1 %v3780_v1 }
  0xcf   : > { %836 = vmatmul.mubr.bf16.gmra.mrb[8].mxu0 %v634_v58  ;;  %3224 = vmatmul.mubr.bf16.gmra.mrb[8].mxu1 %v636_v59 }
  0xd0   : > { %3243 = vmatprep.mubr.msk.bf16.mxu1 %vm3781_vm0, %v3780_v1 }
  0xd1   : > { %3056 = vmatpush3.bf16.msra.mxu0 %v3465_v63  ;;  %3236 = vmatpush3.bf16.msra.mxu1 %v3469_v5  ;;  %v3479_v63 = vld [vmem:[#allocation7 + $0x108] sm:$0xff]  }
  0xd2   : > { %3057 = vmatprep.subr.bf16.mxu0 %v3467_v3  ;;  %3237 = vmatprep.subr.bf16.mxu1 %v3780_v1 }
  0xd5   : > { %3058 = vmatpush3.bf16.msra.mxu0 %v3468_v4  ;;  %3238 = vmatpush3.bf16.msra.mxu1 %v3472_v8 }
  0xd6   : > { %3059 = vmatprep.subr.bf16.mxu0 %v3470_v6  ;;  %3239 = vmatprep.subr.bf16.mxu1 %v3780_v1 }
  0xd9   : > { %3060 = vmatpush3.bf16.msra.mxu0 %v3471_v7  ;;  %3240 = vmatpush3.bf16.msra.mxu1 %v3475_v11 }
  0xda   : > { %3061 = vmatprep.subr.bf16.mxu0 %v3473_v9  ;;  %3241 = vmatprep.subr.bf16.mxu1 %v3780_v1 }
  0xdd   : > { %3062 = vmatpush3.bf16.msra.mxu0 %v3474_v10  ;;  %3242 = vmatpush3.bf16.msra.mxu1 %v3476_v12 }
  0xde   : > { %3255 = vmatprep.subr.bf16.mxu1 %v3780_v1  ;;  %3092 = vmatprep.subr.bf16.mxu0 %v3477_v14  ;;  %v3480_v14 = vld [vmem:[#allocation7 + $0xc8] sm:$0xff]  }
 0x192   : > { %v3018_v15 = vpop.f32.mrb[0].mxu0  ;;  %v877_v18 = vpop.f32.mrb[0].mxu1 }
 0x193   : > { %v3019_v16 = vpop.f32.mrb[1].mxu0  ;;  %v3217_v21 = vpop.f32.mrb[1].mxu1 }
 0x194   : > { %v3020_v19 = vadd.f32 %v3019_v16, %v3018_v15  ;;  %v3021_v20 = vpop.f32.mrb[2].mxu0  ;;  %v880_v23 = vpop.f32.mrb[2].mxu1 }
 0x195   : > { %v3022_v22 = vpop.f32.mrb[3].mxu0  ;;  %v3218_v26 = vpop.f32.mrb[3].mxu1 }
 0x196   : > { %v822_v24 = vadd.f32 %v3020_v19, %v2864_v17  ;;  %v3023_v25 = vadd.f32 %v3022_v22, %v3021_v20  ;;  %v3482_v20 = vld [vmem:[#allocation7 + $0x110] sm:$0xff]  }
 0x198   : > { %v878_v27 = vadd.f32 %v877_v18, %v822_v24  ;;  %v825_v28 = vadd.f32 %v3023_v25, %v2864_v17  ;;  %v3481_v24 = vld [vmem:[#allocation7 + $0x140] sm:$0xff]  }
 0x19a   : > { %v4244_v29 = vmax.f32 %v878_v27, 0.0  ;;  %v881_v30 = vadd.f32 %v880_v23, %v825_v28  ;;  %v3024_v32 = vpop.f32.mrb[4].mxu0  ;;  %v885_v35 = vpop.f32.mrb[4].mxu1 }
 0x19b   : > { %v3025_v33 = vpop.f32.mrb[5].mxu0  ;;  %v3221_v38 = vpop.f32.mrb[5].mxu1 }
 0x19c   : > { %v4246_v36 = vmax.f32 %v881_v30, 0.0  ;;  %v3026_v31 = vadd.f32 %v3025_v33, %v3024_v32  ;;  %v3027_v37 = vpop.f32.mrb[6].mxu0  ;;  %v958_v40 = vrot.slane %v4244_v29, 7  ;;  %v888_v42 = vpop.f32.mrb[6].mxu1  ;;  %v978_v55 = vrot.slane %v4244_v29, 1 }
 0x19d   : > { %v3028_v41 = vpop.f32.mrb[7].mxu0  ;;  %v3222_v46 = vpop.f32.mrb[7].mxu1 }
 0x19e   : > { %v959_v43 = vrot.slane %v4246_v36, 7  ;;  %v830_v44 = vadd.f32 %v3026_v31, %v2864_v17  ;;  %v3029_v45 = vadd.f32 %v3028_v41, %v3027_v37  ;;  %v979_v47 = vrot.slane %v4246_v36, 1 }
 0x19f   : > { %v999_v48 = vpack.c.bf16 %v4246_v36, %v4244_v29  ;;  %v972_v49 = vsel %vm566_vm2, %v4244_v29, %v958_v40 }
 0x1a0   : > { %v886_v50 = vadd.f32 %v885_v35, %v830_v44  ;;  %v833_v34 = vadd.f32 %v3029_v45, %v2864_v17  ;;  %v960_v51 = vsel %vm566_vm2, %v958_v40, %v959_v43  ;;  %v973_v52 = vsel %vm497_vm11, %v4244_v29, %v972_v49  ;;  %v3483_v35 = vld [vmem:[#allocation7 + $0xd0] sm:$0xff]  }
 0x1a1   : > { %1189 = vmatprep.mubr.bf16.mxu0 %v999_v48  ;;  %v974_v53 = vsel %vm498_vm13, %v4246_v36, %v960_v51  ;;  %v980_v4 = vsel %vm597_vm5, %v978_v55, %v979_v47  ;;  %v3484_v51 = vld [vmem:[#allocation7 + $0x148] sm:$0xff]   ;;  %v3487_v55 = vld [vmem:[#allocation7 + $0x150] sm:$0xff]  }
 0x1a2   : > { %v4263_v58 = vmax.f32 %v886_v50, 0.0  ;;  %v889_v59 = vadd.f32 %v888_v42, %v833_v34  ;;  %v3030_v60 = vpop.f32.mrb[8].mxu0  ;;  %v998_v61 = vpack.c.bf16 %v974_v53, %v973_v52  ;;  %v893_v3 = vpop.f32.mrb[8].mxu1  ;;  %v993_v21 = vsel %vm502_vm14, %v4244_v29, %v980_v4  ;;  %v3485_v52 = vld [vmem:[#allocation7 + $0x118] sm:$0xff]   ;;  %v3495_v4 = vld [vmem:[#allocation7 + $0xf0] sm:$0xff]  }
 0x1a3   : > { %v3031_v0 = vpop.f32.mrb[9].mxu0  ;;  %v3225_v9 = vpop.f32.mrb[9].mxu1  ;;  %v3486_v53 = vld [vmem:[#allocation7 + $0xd8] sm:$0xff]  }
 0x1a4   : > { %v981_v5 = vrot.slane %v4263_v58, 1  ;;  %v4267_v6 = vmax.f32 %v889_v59, 0.0  ;;  %v3032_v7 = vadd.f32 %v3031_v0, %v3030_v60  ;;  %v3033_v8 = vpop.f32.mrb[10].mxu0  ;;  %1190 = vmatmul.mubr.bf16.vlgmr.msra.gmra.mrb[12].mxu0 %v998_v61  ;;  %v961_v10 = vrot.slane %v4263_v58, 7  ;;  %v896_v12 = vpop.f32.mrb[10].mxu1  ;;  %v3489_v59 = vld [vmem:[#allocation7 + $0xe0] sm:$0xff]  }
 0x1a5   : > { %v3034_v11 = vpop.f32.mrb[11].mxu0  ;;  %3093 = vmatpush3.bf16.msra.mxu0 %v3478_v57  ;;  %v3226_v16 = vpop.f32.mrb[11].mxu1  ;;  %v3488_v57 = vld [vmem:[#allocation7 + $0x120] sm:$0xff]   ;;  %v3490_v60 = vld [vmem:[#allocation7 + $0x158] sm:$0xff]   ;;  %v3491_v61 = vld [vmem:[#allocation7 + $0x128] sm:$0xff]  }
 0x1a6   : > { %v838_v15 = vadd.f32 %v3032_v7, %v2864_v17  ;;  %v1002_v18 = vpack.c.bf16 %v4267_v6, %v4263_v58  ;;  %v982_v19 = vsel %vm597_vm5, %v979_v47, %v981_v5  ;;  %3094 = vmatprep.subr.bf16.mxu0 %v3479_v63  ;;  %v962_v23 = vsel %vm566_vm2, %v959_v43, %v961_v10  ;;  %v3492_v63 = vld [vmem:[#allocation7 + $0xe8] sm:$0xff]   ;;  %v3493_v0 = vld [vmem:[#allocation7 + $0x160] sm:$0xff]   ;;  %v3497_v7 = vld [vmem:[#allocation7 + $0x138] sm:$0xff]  }
 0x1a7   : > { %v994_v22 = vsel %vm503_vm15, %v4246_v36, %v982_v19  ;;  %v963_v17 = vrot.slane %v4267_v6, 7  ;;  %v983_v27 = vrot.slane %v4267_v6, 1  ;;  %v975_v32 = vsel %vm499_vm1, %v4263_v58, %v962_v23  ;;  %v3498_v8 = vld [vmem:[#allocation7 + $0xf8] sm:$0xff]   ;;  %v3499_v9 = vld [vmem:[#allocation7 + $0x170] sm:$0xff]  }
 0x1a8   : > { %v894_v25 = vadd.f32 %v893_v3, %v838_v15  ;;  %1197 = vmatprep.mubr.bf16.mxu0 %v1002_v18  ;;  %v1000_v26 = vpack.c.bf16 %v994_v22, %v993_v21  ;;  %v3494_v3 = vld [vmem:[#allocation7 + $0x130] sm:$0xff]  }
 0x1a9   : > { %v964_v28 = vsel %vm566_vm2, %v961_v10, %v963_v17  ;;  %3095 = vmatpush3.bf16.msra.mxu0 %v3480_v14  ;;  %v984_v38 = vsel %vm597_vm5, %v981_v5, %v983_v27  ;;  %v3496_v5 = vld [vmem:[#allocation7 + $0x168] sm:$0xff]   ;;  %v3500_v10 = vld [vmem:[#allocation7 + $0x178] sm:$0xff]   ;;  %v2889_v14 = vld [vmem:[%s4568_s4] ss:$0 sm:$0xff] }
 0x1aa   : > { %v4283_v30 = vmax.f32 %v894_v25, 0.0  ;;  %3244 = vmatmul.mubr.bf16.vlgmr.msra.gmra.mrb[12].mxu1 %v1000_v26  ;;  %v976_v33 = vsel %vm500_vm8, %v4267_v6, %v964_v28  ;;  %3096 = vmatprep.subr.bf16.mxu0 %v3482_v20  ;;  %v995_v44 = vsel %vm504_vm3, %v4263_v58, %v984_v38 }
 0x1ab   : > { %v1001_v31 = vpack.c.bf16 %v976_v33, %v975_v32  ;;  %3247 = vmatprep.mubr.msk.bf16.mxu1 %vm3781_vm0, %v3780_v1  ;;  %3256 = vmatpush3.bf16.msra.mxu1 %v3481_v24 }
 0x1ac   : > { %v1005_v37 = vpack.c.bf16 %v4283_v30, %v4283_v30  ;;  %v985_v40 = vrot.slane %v4283_v30, 1  ;;  %v965_v41 = vrot.slane %v4283_v30, 7  ;;  %3257 = vmatprep.subr.bf16.mxu1 %v3780_v1 }
 0x1ad   : > { %1198 = vmatmul.mubr.bf16.gmra.mrb[16].mxu0 %v1001_v31 }
 0x1ae   : > { %1205 = vmatprep.mubr.bf16.mxu0 %v1005_v37  ;;  %v986_v42 = vsel %vm597_vm5, %v983_v27, %v985_v40  ;;  %v966_v43 = vsel %vm566_vm2, %v963_v17, %v965_v41  ;;  %3097 = vmatpush3.bf16.msra.mxu0 %v3483_v35  ;;  %v992_v48 = vsel %vm597_vm5, %v985_v40, %v4283_v30 }
 0x1af   : > { %v996_v45 = vsel %vm505_vm9, %v4267_v6, %v986_v42  ;;  %v977_v47 = vsel %vm501_vm6, %v4283_v30, %v966_v43  ;;  %v997_v50 = vsel %vm506_vm7, %v4283_v30, %v992_v48  ;;  %3258 = vmatpush3.bf16.msra.mxu1 %v3484_v51  ;;  %3098 = vmatprep.subr.bf16.mxu0 %v3485_v52 }
 0x1b0   : > { %v1003_v46 = vpack.c.bf16 %v996_v45, %v995_v44  ;;  %v1004_v49 = vpack.c.bf16 %v977_v47, %v977_v47  ;;  %v1006_v34 = vpack.c.bf16 %v997_v50, %v997_v50  ;;  %3259 = vmatprep.subr.bf16.mxu1 %v3780_v1 }
 0x1b2   : > { %3248 = vmatmul.mubr.bf16.gmra.mrb[16].mxu1 %v1003_v46  ;;  %3099 = vmatpush3.bf16.msra.mxu0 %v3486_v53 }
 0x1b3   : > { %3251 = vmatprep.mubr.msk.bf16.mxu1 %vm3781_vm0, %v3780_v1  ;;  %3260 = vmatpush3.bf16.msra.mxu1 %v3487_v55 }
 0x1b4   : > { %3100 = vmatprep.subr.bf16.mxu0 %v3488_v57  ;;  %3261 = vmatprep.subr.bf16.mxu1 %v3780_v1 }
 0x1b5   : > { %1206 = vmatmul.mubr.bf16.gmra.mrb[20].mxu0 %v1004_v49 }
 0x1b6   : > { %3101 = vmatpush3.bf16.msra.mxu0 %v3489_v59 }
 0x1b7   : > { %3262 = vmatpush3.bf16.msra.mxu1 %v3490_v60  ;;  %3102 = vmatprep.subr.bf16.mxu0 %v3491_v61 }
 0x1b8   : > { %3263 = vmatprep.subr.bf16.mxu1 %v3780_v1 }
 0x1ba   : > { %3252 = vmatmul.mubr.bf16.gmra.mrb[20].mxu1 %v1006_v34  ;;  %3103 = vmatpush3.bf16.msra.mxu0 %v3492_v63 }
 0x1bb   : > { %3271 = vmatprep.mubr.msk.bf16.mxu1 %vm3781_vm0, %v3780_v1  ;;  %3264 = vmatpush3.bf16.msra.mxu1 %v3493_v0 }
 0x1bc   : > { %3104 = vmatprep.subr.bf16.mxu0 %v3494_v3  ;;  %3265 = vmatprep.subr.bf16.mxu1 %v3780_v1 }
 0x1be   : > { %3105 = vmatpush3.bf16.msra.mxu0 %v3495_v4 }
 0x1bf   : > { %3266 = vmatpush3.bf16.msra.mxu1 %v3496_v5  ;;  %3106 = vmatprep.subr.bf16.mxu0 %v3497_v7 }
 0x1c0   : > { %3267 = vmatprep.subr.bf16.mxu1 %v3780_v1 }
 0x1c2   : > { %3107 = vmatpush3.bf16.msra.mxu0 %v3498_v8 }
 0x1c3   : > { %3268 = vmatpush3.bf16.msra.mxu1 %v3499_v9 }
 0x1c4   : > { %3269 = vmatprep.subr.bf16.mxu1 %v3780_v1 }
 0x1c7   : > { %3270 = vmatpush3.bf16.msra.mxu1 %v3500_v10 }
 0x277   : > { %v3063_v11 = vpop.f32.mrb[12].mxu0 }
 0x278   : > { %v3064_v12 = vpop.f32.mrb[13].mxu0 }
 0x279   : > { %v3065_v15 = vadd.f32 %v3064_v12, %v3063_v11  ;;  %v3066_v16 = vpop.f32.mrb[14].mxu0 }
 0x27a   : > { %v3067_v18 = vpop.f32.mrb[15].mxu0 }
 0x27b   : > { %v3068_v19 = vadd.f32 %v3067_v18, %v3066_v16  ;;  %v1192_v20 = vadd.f32 %v3065_v15, %v2889_v14 }
 0x27d   : > { %v1247_v21 = vpop.f32.mrb[12].mxu1  ;;  %v1195_v22 = vadd.f32 %v3068_v19, %v2889_v14 }
 0x27e   : > { %v1248_v23 = vadd.f32 %v1247_v21, %v1192_v20  ;;  %v3245_v17 = vpop.f32.mrb[13].mxu1 }
 0x27f   : > { %v1250_v24 = vpop.f32.mrb[14].mxu1 }
 0x280   : > { %v1269_v25 = vmax.f32 %v1248_v23, 0.0  ;;  %v3069_v26 = vpop.f32.mrb[16].mxu0  ;;  %v1251_v27 = vadd.f32 %v1250_v24, %v1195_v22  ;;  %v3246_v28 = vpop.f32.mrb[15].mxu1 }
 0x281   : > { %v3070_v32 = vpop.f32.mrb[17].mxu0 }
 0x282   : > { %v4329_v33 = vadd.f32 %v1269_v25, %v4244_v29  ;;  %v1270_v35 = vmax.f32 %v1251_v27, 0.0  ;;  %v3071_v31 = vadd.f32 %v3070_v32, %v3069_v26  ;;  %v3072_v37 = vpop.f32.mrb[18].mxu0 }
 0x283   : > { %v3073_v38 = vpop.f32.mrb[19].mxu0 }
 0x284   : > { %v4332_v40 = vadd.f32 %v1270_v35, %v4246_v36  ;;  %v3074_v41 = vadd.f32 %v3073_v38, %v3072_v37  ;;  %v1200_v42 = vadd.f32 %v3071_v31, %v2889_v14  ;;  %v1335_v43 = vrot.slane %v4329_v33, 7 }
 0x285   : > { %v1255_v44 = vpop.f32.mrb[16].mxu1  ;;  %v1355_v61 = vrot.slane %v4329_v33, 1 }
 0x286   : > { %v1256_v45 = vadd.f32 %v1255_v44, %v1200_v42  ;;  %v3249_v46 = vpop.f32.mrb[17].mxu1  ;;  %v1203_v47 = vadd.f32 %v3074_v41, %v2889_v14  ;;  %v1376_v48 = vpack.c.bf16 %v4332_v40, %v4329_v33  ;;  %v1336_v29 = vrot.slane %v4332_v40, 7 }
 0x287   : > { %v1258_v49 = vpop.f32.mrb[18].mxu1  ;;  %v1349_v50 = vsel %vm566_vm2, %v4329_v33, %v1335_v43  ;;  %v1356_v36 = vrot.slane %v4332_v40, 1 }
 0x288   : > { %v1271_v34 = vmax.f32 %v1256_v45, 0.0  ;;  %v3075_v51 = vpop.f32.mrb[20].mxu0  ;;  %v1259_v52 = vadd.f32 %v1258_v49, %v1203_v47  ;;  %v3250_v53 = vpop.f32.mrb[19].mxu1  ;;  %1566 = vmatprep.mubr.bf16.mxu0 %v1376_v48  ;;  %v1337_v55 = vsel %vm566_vm2, %v1335_v43, %v1336_v29  ;;  %v1350_v59 = vsel %vm497_vm11, %v4329_v33, %v1349_v50  ;;  %v3501_v47 = vld [vmem:[#allocation8 + $0x40] sm:$0xff]   ;;  %v3504_v49 = vld [vmem:[#allocation8 + $0x48] sm:$0xff]  }
 0x289   : > { %v3076_v57 = vpop.f32.mrb[21].mxu0  ;;  %v1351_v60 = vsel %vm498_vm13, %v4332_v40, %v1337_v55  ;;  %v1357_v8 = vsel %vm597_vm5, %v1355_v61, %v1356_v36  ;;  %3137 = vmatprep.subr.bf16.mxu0 %v3501_v47  ;;  %v3502_v48 = vld [vmem:[#allocation8] sm:$0xff]   ;;  %v3511_v53 = vld [vmem:[#allocation8 + $0xd0] sm:$0xff]   ;;  %v3512_v55 = vld [vmem:[#allocation8 + $0x58] sm:$0xff]  }
 0x28a   : > { %v4350_v63 = vadd.f32 %v1271_v34, %v4263_v58  ;;  %v1272_v0 = vmax.f32 %v1259_v52, 0.0  ;;  %v3077_v3 = vadd.f32 %v3076_v57, %v3075_v51  ;;  %v3078_v4 = vpop.f32.mrb[22].mxu0  ;;  %v1375_v5 = vpack.c.bf16 %v1351_v60, %v1350_v59  ;;  %v3505_v50 = vld [vmem:[#allocation8 + $0x80] sm:$0xff]   ;;  %v3507_v34 = vld [vmem:[#allocation8 + $0xc8] sm:$0xff]   ;;  %v3508_v51 = vld [vmem:[#allocation8 + $0x50] sm:$0xff]  }
 0x28b   : > { %v3079_v7 = vpop.f32.mrb[23].mxu0  ;;  %v3509_v52 = vld [vmem:[#allocation8 + $0x88] sm:$0xff]   ;;  %v3513_v57 = vld [vmem:[#allocation8 + $0x90] sm:$0xff]   ;;  %v3514_v59 = vld [vmem:[#allocation8 + $0x18] sm:$0xff]  }
 0x28c   : > { %v4354_v9 = vadd.f32 %v1272_v0, %v4267_v6  ;;  %1567 = vmatmul.mubr.bf16.vlgmr.msra.gmra.mrb[24].mxu0 %v1375_v5  ;;  %v1208_v10 = vadd.f32 %v3077_v3, %v2889_v14  ;;  %v1358_v11 = vrot.slane %v4350_v63, 1  ;;  %v1338_v12 = vrot.slane %v4350_v63, 7  ;;  %v3515_v60 = vld [vmem:[#allocation8 + $0xd8] sm:$0xff]   ;;  %v3516_v61 = vld [vmem:[#allocation8 + $0x60] sm:$0xff]   ;;  %v3520_v5 = vld [vmem:[#allocation8 + $0x68] sm:$0xff]  }
 0x28d   : > { %v1263_v15 = vpop.f32.mrb[20].mxu1  ;;  %v1370_v6 = vsel %vm502_vm14, %v4329_v33, %v1357_v8  ;;  %3138 = vmatpush3.bf16.msra.mxu0 %v3502_v48  ;;  %v3517_v0 = vld [vmem:[#allocation8 + $0x98] sm:$0xff]   ;;  %v3518_v3 = vld [vmem:[#allocation8 + $0x20] sm:$0xff]   ;;  %v3522_v8 = vld [vmem:[#allocation8 + $0x28] sm:$0xff]  }
 0x28e   : > { %v1264_v16 = vadd.f32 %v1263_v15, %v1208_v10  ;;  %v3253_v58 = vpop.f32.mrb[21].mxu1  ;;  %v1379_v18 = vpack.c.bf16 %v4354_v9, %v4350_v63  ;;  %v1359_v19 = vsel %vm597_vm5, %v1356_v36, %v1358_v11  ;;  %v1339_v21 = vsel %vm566_vm2, %v1336_v29, %v1338_v12  ;;  %v3503_v29 = vld [vmem:[#allocation8 + $0xc0] sm:$0xff]   ;;  %v3506_v36 = vld [vmem:[#allocation8 + $0x8] sm:$0xff]   ;;  %3139 = vmatprep.subr.bf16.mxu0 %v3504_v49  ;;  %v3526_v15 = vld [vmem:[#allocation8 + $0x30] sm:$0xff]  }
 0x28f   : > { %v1266_v20 = vpop.f32.mrb[22].mxu1  ;;  %v1371_v14 = vsel %vm503_vm15, %v4332_v40, %v1359_v19  ;;  %v1340_v22 = vrot.slane %v4354_v9, 7  ;;  %v1360_v25 = vrot.slane %v4354_v9, 1  ;;  %v1352_v56 = vsel %vm499_vm1, %v4350_v63, %v1339_v21  ;;  %3159 = vmatprep.subr.bf16.mxu1 %v3503_v29  ;;  %v3519_v4 = vld [vmem:[#allocation8 + $0xe0] sm:$0xff]   ;;  %v3523_v10 = vld [vmem:[#allocation8 + $0xe8] sm:$0xff]   ;;  %v3528_v58 = vld [vmem:[#allocation8 + $0x78] sm:$0xff]  }
 0x290   : > { %v1273_v23 = vmax.f32 %v1264_v16, 0.0  ;;  %v3254_v17 = vpop.f32.mrb[23].mxu1  ;;  %1574 = vmatprep.mubr.bf16.mxu0 %v1379_v18  ;;  %v1377_v24 = vpack.c.bf16 %v1371_v14, %v1370_v6  ;;  %v3521_v7 = vld [vmem:[#allocation8 + $0xa0] sm:$0xff]   ;;  %v3527_v16 = vld [vmem:[#allocation8 + $0xf0] sm:$0xff]   ;;  %v3530_v19 = vld [vmem:[#allocation8 + $0x38] sm:$0xff]  }
 0x291   : > { %v1341_v26 = vsel %vm566_vm2, %v1338_v12, %v1340_v22  ;;  %v1361_v35 = vsel %vm597_vm5, %v1358_v11, %v1360_v25  ;;  %3140 = vmatpush3.bf16.msra.mxu0 %v3506_v36  ;;  %v3524_v11 = vld [vmem:[#allocation8 + $0x70] sm:$0xff]   ;;  %v3525_v12 = vld [vmem:[#allocation8 + $0xa8] sm:$0xff]   ;;  %v3531_v20 = vld [vmem:[#allocation8 + $0xf8] sm:$0xff]   ;;  %v3782_v21 = vmov 1966171168  }
 0x292   : > { %v4372_v27 = vadd.f32 %v1273_v23, %v4283_v30  ;;  %3272 = vmatmul.mubr.bf16.vlgmr.msra.gmra.mrb[24].mxu1 %v1377_v24  ;;  %v1353_v62 = vsel %vm500_vm8, %v4354_v9, %v1341_v26  ;;  %v1372_v41 = vsel %vm504_vm3, %v4350_v63, %v1361_v35  ;;  %3141 = vmatprep.subr.bf16.mxu0 %v3508_v51  ;;  %v3529_v18 = vld [vmem:[#allocation8 + $0xb0] sm:$0xff]   ;;  %v3532_v6 = vld [vmem:[#allocation8 + $0xb8] sm:$0xff]  }
 0x293   : > { %v1378_v28 = vpack.c.bf16 %v1353_v62, %v1352_v56  ;;  %3275 = vmatprep.mubr.msk.bf16.mxu1 %vm3781_vm0, %v3780_v1  ;;  %3160 = vmatpush3.bf16.msra.mxu1 %v3505_v50  ;;  %v4410_v17 = vld [vmem:[%s4568_s4 + $0x1] ss:$0 sm:$0xff] }
 0x294   : > { %v1382_v32 = vpack.c.bf16 %v4372_v27, %v4372_v27  ;;  %v1362_v30 = vrot.slane %v4372_v27, 1  ;;  %v1342_v31 = vrot.slane %v4372_v27, 7  ;;  %3161 = vmatprep.subr.bf16.mxu1 %v3507_v34 }
 0x295   : > { %1575 = vmatmul.mubr.bf16.gmra.mrb[28].mxu0 %v1378_v28 }
 0x296   : > { %1582 = vmatprep.mubr.bf16.mxu0 %v1382_v32  ;;  %v1363_v37 = vsel %vm597_vm5, %v1360_v25, %v1362_v30  ;;  %v1343_v38 = vsel %vm566_vm2, %v1340_v22, %v1342_v31  ;;  %v1369_v45 = vsel %vm597_vm5, %v1362_v30, %v4372_v27  ;;  %3142 = vmatpush3.bf16.msra.mxu0 %v3510_v54  ;;  %v1663_v22 = vunpack.c.l.s4 %v3782_v21 }
 0x297   : > { %v1373_v42 = vsel %vm505_vm9, %v4354_v9, %v1363_v37  ;;  %v1354_v44 = vsel %vm501_vm6, %v4372_v27, %v1343_v38  ;;  %v1374_v13 = vsel %vm506_vm7, %v4372_v27, %v1369_v45  ;;  %3162 = vmatpush3.bf16.msra.mxu1 %v3509_v52  ;;  %3143 = vmatprep.subr.bf16.mxu0 %v3512_v55 }
 0x298   : > { %v1380_v43 = vpack.c.bf16 %v1373_v42, %v1372_v41  ;;  %v1381_v46 = vpack.c.bf16 %v1354_v44, %v1354_v44  ;;  %v1383_v39 = vpack.c.bf16 %v1374_v13, %v1374_v13  ;;  %3163 = vmatprep.subr.bf16.mxu1 %v3511_v53  ;;  %v1664_v28 = vunpack.c.0.s8 %v1663_v22 }
 0x29a   : > { %3276 = vmatmul.mubr.bf16.gmra.mrb[28].mxu1 %v1380_v43  ;;  %3144 = vmatpush3.bf16.msra.mxu0 %v3514_v59  ;;  %v4415_v38 = vsub.s32 %v1664_v28, %v4076_v2 }
 0x29b   : > { %3279 = vmatprep.mubr.msk.bf16.mxu1 %vm3781_vm0, %v3780_v1  ;;  %3164 = vmatpush3.bf16.msra.mxu1 %v3513_v57 }
 0x29c   : > { %3165 = vmatprep.subr.bf16.mxu1 %v3515_v60  ;;  %3145 = vmatprep.subr.bf16.mxu0 %v3516_v61 }
 0x29d   : > { %1583 = vmatmul.mubr.bf16.gmra.mrb[32].mxu0 %v1381_v46 }
 0x29e   : > { %3146 = vmatpush3.bf16.msra.mxu0 %v3518_v3 }
 0x29f   : > { %3166 = vmatpush3.bf16.msra.mxu1 %v3517_v0  ;;  %3147 = vmatprep.subr.bf16.mxu0 %v3520_v5 }
 0x2a0   : > { %3167 = vmatprep.subr.bf16.mxu1 %v3519_v4 }
 0x2a2   : > { %3280 = vmatmul.mubr.bf16.gmra.mrb[32].mxu1 %v1383_v39  ;;  %3148 = vmatpush3.bf16.msra.mxu0 %v3522_v8 }
 0x2a3   : > { %3168 = vmatpush3.bf16.msra.mxu1 %v3521_v7  ;;  %3149 = vmatprep.subr.bf16.mxu0 %v3524_v11 }
 0x2a4   : > { %3169 = vmatprep.subr.bf16.mxu1 %v3523_v10 }
 0x2a6   : > { %3150 = vmatpush3.bf16.msra.mxu0 %v3526_v15 }
 0x2a7   : > { %3170 = vmatpush3.bf16.msra.mxu1 %v3525_v12  ;;  %3151 = vmatprep.subr.bf16.mxu0 %v3528_v58 }
 0x2a8   : > { %3171 = vmatprep.subr.bf16.mxu1 %v3527_v16 }
 0x2aa   : > { %3152 = vmatpush3.bf16.msra.mxu0 %v3530_v19 }
 0x2ab   : > { %3172 = vmatpush3.bf16.msra.mxu1 %v3529_v18  ;;  %3283 = vmatprep.subr.bf16.mxu0 %v3780_v1 }
 0x2ac   : > { %3173 = vmatprep.subr.bf16.mxu1 %v3531_v20 }
 0x2af   : > { %3174 = vmatpush3.bf16.msra.mxu1 %v3532_v6 }
 0x2b0   : > { %3303 = vmatprep.subr.bf16.mxu1 %v3780_v1 }
 0x35f   : > { %v3108_v14 = vpop.f32.mrb[24].mxu0 }
 0x360   : > { %v3109_v23 = vpop.f32.mrb[25].mxu0 }
 0x361   : > { %v3110_v24 = vadd.f32 %v3109_v23, %v3108_v14  ;;  %v3111_v25 = vpop.f32.mrb[26].mxu0 }
 0x362   : > { %v3112_v26 = vpop.f32.mrb[27].mxu0 }
 0x363   : > { %v3113_v56 = vadd.f32 %v3112_v26, %v3111_v25  ;;  %v1569_v62 = vadd.f32 %v3110_v24, %v4410_v17 }
 0x365   : > { %v1624_v32 = vpop.f32.mrb[24].mxu1  ;;  %v1572_v35 = vadd.f32 %v3113_v56, %v4410_v17 }
 0x366   : > { %v1625_v30 = vadd.f32 %v1624_v32, %v1569_v62  ;;  %v3273_v31 = vpop.f32.mrb[25].mxu1 }
 0x367   : > { %v1627_v37 = vpop.f32.mrb[26].mxu1 }
 0x368   : > { %v1646_v41 = vmax.f32 %v1625_v30, 0.0  ;;  %v3114_v42 = vpop.f32.mrb[28].mxu0  ;;  %v1628_v43 = vadd.f32 %v1627_v37, %v1572_v35  ;;  %v3274_v44 = vpop.f32.mrb[27].mxu1 }
 0x369   : > { %v3115_v45 = vpop.f32.mrb[29].mxu0 }
 0x36a   : > { %v1651_v46 = vadd.f32 %v1646_v41, %v4329_v33  ;;  %v1647_v13 = vmax.f32 %v1628_v43, 0.0  ;;  %v3116_v39 = vadd.f32 %v3115_v45, %v3114_v42  ;;  %v3117_v47 = vpop.f32.mrb[30].mxu0 }
 0x36b   : > { %v3118_v48 = vpop.f32.mrb[31].mxu0 }
 0x36c   : > { %v1661_v29 = vcombine.high %v1651_v46, %v1651_v46  ;;  %v1668_v49 = vrot.slane %v1651_v46, %v4415_v38  ;;  %v1652_v50 = vadd.f32 %v1647_v13, %v4332_v40  ;;  %v3119_v36 = vadd.f32 %v3118_v48, %v3117_v47 }
 0x36d   : > { %v1577_v2 = vadd.f32 %v3116_v39, %v4410_v17  ;;  %v1632_v34 = vpop.f32.mrb[28].mxu1 }
 0x36e   : > { %v1675_v51 = vrot.slane %v1661_v29, %v4415_v38  ;;  %v1676_v52 = vcombine.high %v1668_v49, %v1668_v49  ;;  %v1684_v54 = vrot.slane %v1668_v49, %v4415_v38  ;;  %v1710_v53 = vcombine.high %v1652_v50, %v1652_v50  ;;  %v3277_v33 = vpop.f32.mrb[29].mxu1 }
 0x36f   : > { %v1717_v55 = vrot.slane %v1652_v50, %v4415_v38  ;;  %v1633_v57 = vadd.f32 %v1632_v34, %v1577_v2  ;;  %v1580_v59 = vadd.f32 %v3119_v36, %v4410_v17  ;;  %v1635_v60 = vpop.f32.mrb[30].mxu1 }
 0x370   : > { %v1677_v61 = vcombine.high %v1675_v51, %v1675_v51  ;;  %v1691_v40 = vrot.slane %v1675_v51, %v4415_v38  ;;  %v1698_v0 = vrot.slane %v1676_v52, %v4415_v38  ;;  %v1724_v3 = vrot.slane %v1710_v53, %v4415_v38  ;;  %v3120_v4 = vpop.f32.mrb[32].mxu0  ;;  %v3278_v5 = vpop.f32.mrb[31].mxu1 }
 0x371   : > { %v1725_v7 = vcombine.high %v1717_v55, %v1717_v55  ;;  %v1733_v8 = vrot.slane %v1717_v55, %v4415_v38  ;;  %v1648_v10 = vmax.f32 %v1633_v57, 0.0  ;;  %v1636_v11 = vadd.f32 %v1635_v60, %v1580_v59  ;;  %v3121_v12 = vpop.f32.mrb[33].mxu0 }
 0x372   : > { %v1705_v15 = vrot.slane %v1677_v61, %v4415_v38  ;;  %v1707_v16 = vcombine.high %v1691_v40, %v1691_v40  ;;  %v1708_v58 = vcombine.high %v1698_v0, %v1698_v0  ;;  %v1726_v18 = vcombine.high %v1724_v3, %v1724_v3  ;;  %v3123_v19 = vpop.f32.mrb[34].mxu0 }
 0x373   : > { %v1740_v20 = vrot.slane %v1724_v3, %v4415_v38  ;;  %v1747_v6 = vrot.slane %v1725_v7, %v4415_v38  ;;  %v1653_v14 = vadd.f32 %v1648_v10, %v4350_v63  ;;  %v1649_v21 = vmax.f32 %v1636_v11, 0.0  ;;  %v3124_v22 = vpop.f32.mrb[35].mxu0 }
 0x374   : > { %v1906_v23 = vcombine.low %v1684_v54, %v1705_v15  ;;  %v1956_v24 = vcombine.low %v1698_v0, %v1707_v16  ;;  %v2942_v25 = vcombine.high %v1684_v54, %v1705_v15  ;;  %v1754_v26 = vrot.slane %v1726_v18, %v4415_v38 }
 0x375   : > { %v4434_v56 = vcombine.low %v1708_v58, %v1733_v8  ;;  %v2106_v62 = vcombine.low %v1691_v40, %v1747_v6  ;;  %v1757_v28 = vcombine.high %v1747_v6, %v1747_v6  ;;  %v1759_v32 = vcombine.high %v1653_v14, %v1653_v14  ;;  %v1640_v35 = vpop.f32.mrb[32].mxu1 }
 0x376   : > { %v1916_v30 = vrot.slane %v1906_v23, %v4415_v38  ;;  %v2016_v31 = vrot.slane %v2942_v25, %v4415_v38  ;;  %v2940_v37 = vcombine.high %v1733_v8, %v1754_v26  ;;  %v1766_v63 = vrot.slane %v1653_v14, %v4415_v38  ;;  %v3281_v41 = vpop.f32.mrb[33].mxu1 }
 0x377   : > { %v4440_v42 = vrot.slane %v2106_v62, %v4415_v38  ;;  %v1773_v43 = vrot.slane %v1759_v32, %v4415_v38  ;;  %v1654_v44 = vadd.f32 %v1649_v21, %v4354_v9  ;;  %v3122_v45 = vadd.f32 %v3121_v12, %v3120_v4  ;;  %v1643_v46 = vpop.f32.mrb[34].mxu1 }
 0x378   : > { %v1923_v13 = vrot.slane %v2940_v37, %v4415_v38  ;;  %v1774_v39 = vcombine.high %v1766_v63, %v1766_v63  ;;  %v1782_v47 = vrot.slane %v1766_v63, %v4415_v38  ;;  %v3282_v48 = vpop.f32.mrb[35].mxu1  ;;  %v1966_v29 = vrot.slane %v1956_v24, %v4415_v38 }
 0x379   : > { %v1775_v49 = vcombine.high %v1773_v43, %v1773_v43  ;;  %v1789_v50 = vrot.slane %v1773_v43, %v4415_v38  ;;  %v1808_v36 = vcombine.high %v1654_v44, %v1654_v44  ;;  %v1815_v2 = vrot.slane %v1654_v44, %v4415_v38 }
 0x37a   : > { %v1938_v34 = vcombine.low %v1916_v30, %v1923_v13  ;;  %v1796_v51 = vrot.slane %v1774_v39, %v4415_v38  ;;  %v1804_v9 = vcombine.high %v1782_v47, %v1782_v47  ;;  %v1957_v52 = vcombine.low %v1757_v28, %v1782_v47 }
 0x37b   : > { %v1803_v54 = vrot.slane %v1775_v49, %v4415_v38  ;;  %v1822_v53 = vrot.slane %v1808_v36, %v4415_v38  ;;  %v1823_v33 = vcombine.high %v1815_v2, %v1815_v2  ;;  %v1831_v55 = vrot.slane %v1815_v2, %v4415_v38 }
 0x37c   : > { %v2007_v57 = vcombine.low %v1740_v20, %v1796_v51  ;;  %v2057_v59 = vcombine.low %v1754_v26, %v1804_v9  ;;  %v2944_v60 = vcombine.high %v1740_v20, %v1796_v51  ;;  %v1585_v61 = vadd.f32 %v3122_v45, %v4410_v17 }
 0x37d   : > { %v1807_v40 = vcombine.high %v1803_v54, %v1803_v54  ;;  %v1824_v0 = vcombine.high %v1822_v53, %v1822_v53  ;;  %v1838_v3 = vrot.slane %v1822_v53, %v4415_v38  ;;  %v1845_v4 = vrot.slane %v1823_v33, %v4415_v38 }
 0x37e   : > { %v2023_v5 = vrot.slane %v2007_v57, %v4415_v38  ;;  %v2123_v7 = vrot.slane %v2944_v60, %v4415_v38  ;;  %v1853_v8 = vcombine.high %v1831_v55, %v1831_v55  ;;  %v1641_v10 = vadd.f32 %v1640_v35, %v1585_v61 }
 0x37f   : > { %v1852_v11 = vrot.slane %v1824_v0, %v4415_v38  ;;  %v1908_v12 = vcombine.low %v1789_v50, %v1845_v4  ;;  %v2943_v15 = vcombine.high %v1789_v50, %v1845_v4  ;;  %v2058_v16 = vcombine.low %v1807_v40, %v1838_v3 }
 0x380   : > { %v2038_v58 = vcombine.low %v2016_v31, %v2023_v5  ;;  %v1958_v18 = vcombine.low %v1803_v54, %v1853_v8  ;;  %v1650_v17 = vmax.f32 %v1641_v10, 0.0  ;;  %v1973_v19 = vrot.slane %v1957_v52, %v4415_v38 }
 0x381   : > { %v1930_v20 = vrot.slane %v1908_v12, %v4415_v38  ;;  %v2030_v6 = vrot.slane %v2943_v15, %v4415_v38  ;;  %v2108_v14 = vcombine.low %v1831_v55, %v1852_v11  ;;  %v1946_v24 = vrot.slane %v1938_v34, %v4415_v38  ;;  %v3533_v12 = vld [vmem:[#allocation8 + $0x100] sm:$0xff]  }
 0x382   : > { %v1655_v21 = vadd.f32 %v1650_v17, %v4372_v27  ;;  %v1980_v22 = vrot.slane %v1958_v18, %v4415_v38  ;;  %v1988_v23 = vcombine.low %v1966_v29, %v1973_v19  ;;  %v2066_v26 = vrot.slane %v4434_v56, %v4415_v38  ;;  %v3536_v18 = vld [vmem:[#allocation8 + $0x118] sm:$0xff]   ;;  %v3537_v17 = vld [vmem:[#allocation8 + $0x120] sm:$0xff]   ;;  %v3538_v19 = vld [vmem:[#allocation8 + $0x128] sm:$0xff]  }
 0x383   : > { %v2130_v25 = vrot.slane %v2108_v14, %v4415_v38  ;;  %v2073_v62 = vrot.slane %v2057_v59, %v4415_v38  ;;  %v2080_v28 = vrot.slane %v2058_v16, %v4415_v38  ;;  %v2046_v27 = vrot.slane %v2038_v58, %v4415_v38  ;;  %v3534_v58 = vld [vmem:[#allocation8 + $0x108] sm:$0xff]  }
 0x384   : > { %v1857_v32 = vcombine.high %v1655_v21, %v1655_v21  ;;  %v1864_v35 = vrot.slane %v1655_v21, %v4415_v38  ;;  %v1996_v30 = vrot.slane %v1988_v23, %v4415_v38  ;;  %v2138_v37 = vcombine.low %v4440_v42, %v2123_v7  ;;  %v3541_v21 = vld [vmem:[#allocation10] sm:$0xff]   ;;  %v3543_v23 = vld [vmem:[#allocation10 + $0x10] sm:$0xff]  }
 0x385   : > { %v2088_v31 = vcombine.low %v2066_v26, %v2073_v62  ;;  %v1856_v45 = vcombine.high %v1852_v11, %v1852_v11  ;;  %v3546_v26 = vld [vmem:[#allocation10 + $0x28] sm:$0xff]   ;;  %v3547_v62 = vld [vmem:[#allocation10 + $0x30] sm:$0xff]  }
 0x386   : > { %v1871_v63 = vrot.slane %v1857_v32, %v4415_v38  ;;  %v1872_v41 = vcombine.high %v1864_v35, %v1864_v35  ;;  %v1880_v43 = vrot.slane %v1864_v35, %v4415_v38  ;;  %v2146_v44 = vrot.slane %v2138_v37, %v4415_v38  ;;  %v2946_v35 = vld [vmem:[%s4570_s6] ss:$0 sm:$0xff] }
 0x387   : > { %v2096_v56 = vrot.slane %v2088_v31, %v4415_v38 }
 0x388   : > { %v1873_v46 = vcombine.high %v1871_v63, %v1871_v63  ;;  %v1887_v13 = vrot.slane %v1871_v63, %v4415_v38  ;;  %v1894_v39 = vrot.slane %v1872_v41, %v4415_v38 }
 0x38a   : > { %v1901_v47 = vrot.slane %v1873_v46, %v4415_v38  ;;  %v1903_v48 = vcombine.high %v1887_v13, %v1887_v13  ;;  %v2941_v29 = vcombine.high %v1838_v3, %v1894_v39  ;;  %v1959_v42 = vcombine.low %v1856_v45, %v1887_v13 }
 0x38c   : > { %v1937_v49 = vrot.slane %v2941_v29, %v4415_v38  ;;  %v2009_v50 = vcombine.low %v1880_v43, %v1901_v47  ;;  %v2059_v36 = vcombine.low %v1894_v39, %v1903_v48  ;;  %v2945_v2 = vcombine.high %v1880_v43, %v1901_v47 }
 0x38d   : > { %v1987_v34 = vrot.slane %v1959_v42, %v4415_v38 }
 0x38e   : > { %v1939_v51 = vcombine.low %v1930_v20, %v1937_v49  ;;  %v2037_v9 = vrot.slane %v2009_v50, %v4415_v38  ;;  %v2137_v52 = vrot.slane %v2945_v2, %v4415_v38  ;;  %v2087_v54 = vrot.slane %v2059_v36, %v4415_v38  ;;  %v3539_v20 = vld [vmem:[#allocation8 + $0x130] sm:$0xff]  }
 0x38f   : > { %v1989_v53 = vcombine.low %v1980_v22, %v1987_v34  ;;  %v3542_v22 = vld [vmem:[#allocation10 + $0x8] sm:$0xff]   ;;  %v2987_v49 = vld [vmem:[%s4572_s8] ss:$0 sm:$0xff] }
 0x390   : > { %v2039_v33 = vcombine.low %v2030_v6, %v2037_v9  ;;  %v1953_v55 = vrot.slane %v1939_v51, %v4415_v38  ;;  %v2089_v57 = vcombine.low %v2080_v28, %v2087_v54  ;;  %v2139_v59 = vcombine.low %v2130_v25, %v2137_v52  ;;  %v3540_v6 = vld [vmem:[#allocation8 + $0x138] sm:$0xff]   ;;  %v3545_v25 = vld [vmem:[#allocation10 + $0x20] sm:$0xff]  }
 0x391   : > { %v2003_v60 = vrot.slane %v1989_v53, %v4415_v38  ;;  %v3548_v28 = vld [vmem:[#allocation10 + $0x38] sm:$0xff]  }
 0x392   : > { %v1954_v61 = vcombine.low %v1946_v24, %v1953_v55  ;;  %v2103_v40 = vrot.slane %v2089_v57, %v4415_v38  ;;  %v2053_v0 = vrot.slane %v2039_v33, %v4415_v38  ;;  %v2153_v3 = vrot.slane %v2139_v59, %v4415_v38  ;;  %v3535_v38 = vld [vmem:[#allocation8 + $0x110] sm:$0xff]   ;;  %v3544_v24 = vld [vmem:[#allocation10 + $0x18] sm:$0xff]  }
 0x393   : > { %v2004_v4 = vcombine.low %v1996_v30, %v2003_v60 }
 0x394   : > { %v2156_v5 = vpack.c.bf16 %v1954_v61, %v1954_v61  ;;  %v2104_v7 = vcombine.low %v2096_v56, %v2103_v40  ;;  %v2054_v8 = vcombine.low %v2046_v27, %v2053_v0  ;;  %v2154_v10 = vcombine.low %v2146_v44, %v2153_v3 }
 0x395   : > { %v2157_v11 = vpack.c.bf16 %v2004_v4, %v2004_v4 }
 0x396   : > { %v2159_v15 = vpack.c.bf16 %v2104_v7, %v2104_v7  ;;  %v2158_v16 = vpack.c.bf16 %v2054_v8, %v2054_v8  ;;  %v2160_v14 = vpack.c.bf16 %v2154_v10, %v2154_v10 }
 0x397   : > { %2520 = vmatprep.mubr.bf16.mxu0 %v2157_v11 }
 0x398   : > { %2521 = vmatmul.mubr.bf16.vlgmr.msra.gmra.mrb[36].mxu0 %v2156_v5  ;;  %2560 = vmatprep.mubr.bf16.mxu1 %v2159_v15 }
 0x399   : > { %3284 = vmatpush3.bf16.msra.mxu0 %v3533_v12  ;;  %2561 = vmatmul.mubr.bf16.vlgmr.msra.gmra.mrb[36].mxu1 %v2158_v16 }
 0x39a   : > { %3285 = vmatprep.subr.bf16.mxu0 %v3780_v1  ;;  %3299 = vmatprep.mubr.msk.bf16.mxu0 %vm3781_vm0, %v3780_v1 }
 0x39b   : > { %3319 = vmatprep.mubr.msk.bf16.mxu1 %vm3781_vm0, %v3780_v1  ;;  %3304 = vmatpush3.bf16.msra.mxu1 %v3541_v21 }
 0x39c   : > { %3305 = vmatprep.subr.bf16.mxu1 %v3780_v1 }
 0x39d   : > { %3286 = vmatpush3.bf16.msra.mxu0 %v3534_v58 }
 0x39e   : > { %3287 = vmatprep.subr.bf16.mxu0 %v3780_v1 }
 0x39f   : > { %3306 = vmatpush3.bf16.msra.mxu1 %v3542_v22 }
 0x3a0   : > { %3307 = vmatprep.subr.bf16.mxu1 %v3780_v1 }
 0x3a1   : > { %3288 = vmatpush3.bf16.msra.mxu0 %v3535_v38 }
 0x3a2   : > { %3289 = vmatprep.subr.bf16.mxu0 %v3780_v1 }
 0x3a3   : > { %3308 = vmatpush3.bf16.msra.mxu1 %v3543_v23 }
 0x3a4   : > { %3309 = vmatprep.subr.bf16.mxu1 %v3780_v1 }
 0x3a5   : > { %3290 = vmatpush3.bf16.msra.mxu0 %v3536_v18 }
 0x3a6   : > { %3291 = vmatprep.subr.bf16.mxu0 %v3780_v1 }
 0x3a7   : > { %3310 = vmatpush3.bf16.msra.mxu1 %v3544_v24 }
 0x3a8   : > { %3311 = vmatprep.subr.bf16.mxu1 %v3780_v1 }
 0x3a9   : > { %3292 = vmatpush3.bf16.msra.mxu0 %v3537_v17 }
 0x3aa   : > { %3293 = vmatprep.subr.bf16.mxu0 %v3780_v1 }
 0x3ab   : > { %3312 = vmatpush3.bf16.msra.mxu1 %v3545_v25 }
 0x3ac   : > { %3313 = vmatprep.subr.bf16.mxu1 %v3780_v1 }
 0x3ad   : > { %3294 = vmatpush3.bf16.msra.mxu0 %v3538_v19 }
 0x3ae   : > { %3295 = vmatprep.subr.bf16.mxu0 %v3780_v1 }
 0x3af   : > { %3314 = vmatpush3.bf16.msra.mxu1 %v3546_v26 }
 0x3b0   : > { %3315 = vmatprep.subr.bf16.mxu1 %v3780_v1 }
 0x3b1   : > { %3296 = vmatpush3.bf16.msra.mxu0 %v3539_v20 }
 0x3b2   : > { %3297 = vmatprep.subr.bf16.mxu0 %v3780_v1 }
 0x3b3   : > { %3316 = vmatpush3.bf16.msra.mxu1 %v3547_v62 }
 0x3b4   : > { %3317 = vmatprep.subr.bf16.mxu1 %v3780_v1 }
 0x3b5   : > { %3298 = vmatpush3.bf16.msra.mxu0 %v3540_v6 }
 0x3b7   : > { %3318 = vmatpush3.bf16.msra.mxu1 %v3548_v28 }
 0x3b8   : > { %3300 = vmatmul.mubr.bf16.vlgmr.msra.gmra.mrb[40].mxu0 %v2160_v14 }
 0x46b   : > { %v3153_v32 = vpop.f32.mrb[36].mxu0 }
 0x46c   : > { %v3154_v30 = vpop.f32.mrb[37].mxu0  ;;  %v3175_v27 = vpop.f32.mrb[36].mxu1 }
 0x46d   : > { %v3155_v31 = vadd.f32 %v3154_v30, %v3153_v32  ;;  %v3156_v37 = vpop.f32.mrb[38].mxu0  ;;  %v3176_v63 = vpop.f32.mrb[37].mxu1 }
 0x46e   : > { %v3157_v41 = vpop.f32.mrb[39].mxu0  ;;  %v3177_v43 = vadd.f32 %v3176_v63, %v3175_v27  ;;  %v3178_v56 = vpop.f32.mrb[38].mxu1 }
 0x46f   : > { %v2523_v44 = vadd.f32 %v3155_v31, %v2946_v35  ;;  %v3179_v45 = vpop.f32.mrb[39].mxu1 }
 0x471   : > { %v2563_v46 = vadd.f32 %v3177_v43, %v2523_v44 }
 0x48b   : > { %v2602_v13 = vpop.f32.mrb[40].mxu0 }
 0x48c   : > { %v2603_v1 = vadd.f32 %v2602_v13, %v2563_v46  ;;  %v3301_v39 = vpop.f32.mrb[41].mxu0 }
 0x48d   : > { %v2605_v47 = vpop.f32.mrb[42].mxu0 }
 0x48e   : > { %v2608_v48 = vmax.f32 %v2603_v1, 0.0  ;;  %v3302_v29 = vpop.f32.mrb[43].mxu0 }
 0x490   : > { %v2609_v42 = vpack.c.bf16 %v2608_v48, %v2608_v48 }
 0x492   : > { %3320 = vmatmul.mubr.bf16.vlgmr.msra.gmra.mrb[40].mxu1 %v2609_v42 }
 0x565   : > { %v2715_v50 = vpop.f32.mrb[40].mxu1 }
 0x566   : > { %v2716_v36 = vadd.f32 %v2987_v49, %v2715_v50  ;;  %v3321_v2 = vpop.f32.mrb[41].mxu1 }
 0x567   : > { %v2718_v34 = vpop.f32.mrb[42].mxu1 }
 0x568   : > { %v2996_v51 = vmul.f32 -1.442695, %v2716_v36  ;;  %v3322_v9 = vpop.f32.mrb[43].mxu1 }
 0x56a   : > { %3549 = vpow2.f32 %v2996_v51 }
 0x574   : > { %v3550_v52 = vpop.eup %3549 }
 0x575   : > { %v2724_v54 = vadd.f32 1.0, %v3550_v52 }
 0x577   : > { %3551 = vrcp.f32 %v2724_v54 }
 0x581   : > { %v3552_v53 = vpop.eup %3551 }
 0x582   : > { %2727 = vst [vmem:[%s408_s21] sm:$0xff] %v3552_v53 }
 0x583   : > { %3708 = shalt.err (!%p3705_p13)
}
 0x584   : > { %s3709_s25 = scalar_lea.hbm %s4520_s23, 128  ;;  %s3713_s30 = scalar_lea.hbm %s4599_s26, 256 }
 0x585   : > { %p3710_p9 = scmp.ne.s32.totalorder %s4520_s23, %s3709_s25  ;;  %p3714_p4 = scmp.lt.u32.totalorder %s4520_s23, %s4599_s26 }
 0x586   : > { %p3715_p8 = scmp.lt.u32.totalorder %s3713_s30, %s3709_s25  ;;  %p3717_p3 = scmp.lt.u32.totalorder %s3709_s25, %s4520_s23 }
 0x587   : > { %p3711_p0 = pnand %p3710_p9, %p4005_p10 }
 0x588   : > { %p3716_p6 = por %p3715_p8, %p3714_p4 }
 0x589   : > { %p3712_p11 = pneg %p3711_p0 }
 0x58a   : > { %p3718_p5 = por %p3717_p3, %p3716_p6 }
 0x58c   : > { %p3719_p7 = pnand %p3718_p5, %p3712_p11 }
 0x58e   : > { %3722 = shalt.err (!%p3719_p7)
}
 0x58f   : > { %3353 = dma.vmem_to_hbm [thread:$0]  (%p4005_p10), %s4522_s29, 128, %s4520_s23, %s2729_s24  }
 0x590 PF: > { %s4600_s15 = sld [smem:[#allocation16_spill]]  ;;  %s4601_s17 = sld [smem:[#allocation17_spill]] }
 0x591   : > { %p4603_p1 = scmp.ge.s32.totalorder %s3769_s12, 2 }
 0x596   : > { %s2754_s22 = sand.u32 1, %s4600_s15   ;;  %p4602_p12 = scmp.ne.s32.totalorder %s4601_s17, 0 }
 0x597   : > { %s2755_s13 = scalar_lea.sflag [#allocation4], %s2754_s22 }
 0x598   : > { %p3373_p2 = pnand %p4603_p1, %p4602_p12 }
 0x59a   : > { %3752 = dma.done.wait (!%p3373_p2), %s2755_s13, 128  }
 0x59b   : > { %3754 = vsyncadd (!%p3373_p2), %s2755_s13, 4294967168  ;;  %p24_p13 = scmp.ge.s32.totalorder %s3995_s14, 4   ;;  %s4604_s30 = smov %s3761_s10 }
 0x59c   : > { %s4605_s10 = smov %s3765_s11  ;;  %s4606_s11 = smov %s4011_s28 }
 0x59d   : > { %s4607_s12 = smov %s3995_s14  ;;  %26 = sbr.rel (!%p24_p13) target bundleno = 9 (0x9), region = 119 }
 0x5a4   :  { %2760 = vsyncpa [#allocation3], 1 }
 0x5a5   :  { %2762 = vsyncpa [#allocation3 + $0x1], 1 }
 0x5a6   :  { %2763 = vsyncpa [#allocation6], 1 }
 0x5a7   :  { %2764 = vsyncpa [#allocation9], 1 }
 0x5a8   :  { %2765 = vsyncpa [#allocation4], 1 }
 0x5a9   :  { %2767 = vsyncpa [#allocation4 + $0x1], 1 }

</bundles_post_ra>
